<compile_context>
chip_gen: v7x
topology: tpu7x:2x2x1
jax: 0.10.0
libtpu: 0.0.40
codegen_flags: <defaults>
</compile_context>

<pallas_src>
import functools

import jax
import jax.numpy as jnp
from jax.experimental import pallas as pl
from jax.experimental.pallas import tpu as pltpu

_LANES = 128


def _flip_flags(to_flip, p, n_flips=7):
    """Per-instance (flip_D, flip_H, flip_W) flags; same bucket semantics as the
    torch module: linspace(0, p, 8) half-open buckets, no flip when to_flip >= p."""
    to_flip = jnp.asarray(to_flip, jnp.float32)
    split = jnp.linspace(0.0, p, n_flips + 1)
    do_flip = to_flip < p                                                   # (B,)
    idx = jnp.sum((to_flip[:, None] >= split[1:n_flips]).astype(jnp.int32), axis=1)
    table = jnp.array([[1, 0, 0],    # flip [1]  (D)
                       [0, 1, 0],    # flip [2]  (H)
                       [0, 0, 1],    # flip [3]  (W)
                       [1, 1, 0],    # flip [1, 2]
                       [1, 0, 1],    # flip [1, 3]
                       [0, 1, 1],    # flip [2, 3]
                       [1, 1, 1]],   # flip [1, 2, 3]
                      jnp.int32)
    return jnp.where(do_flip[:, None], table[idx], 0).astype(jnp.int32)     # (B, 3)


def _static_masks(fd, fh, fw, d, h, w, chunk_rows, n_chunks):
    """Split the XOR mask of the flattened D*H*W index into (lane,
    sublane-in-chunk, chunk-in-block) parts.  Bits above the block level are
    handled by the index_map, so they are not returned here."""
    m = fw * (w - 1) + fh * (h - 1) * w + fd * (d - 1) * h * w
    lane_m = m & (_LANES - 1)
    row_m = m >> 7
    sub_m = row_m & (chunk_rows - 1)
    chunk_m = (row_m >> (chunk_rows.bit_length() - 1)) & (n_chunks - 1)
    return lane_m, sub_m, chunk_m


def _apply_flip(x_ref, o_ref, lane_mask, sub_mask, chunk_mask, chunk_rows, n_chunks):
    """Reverse the lane / in-chunk sublane bits given STATIC masks, routing each
    chunk to its XOR'ed destination rows.  One read + one write per element."""

    def bit_pred(axis, k):
        idx = jax.lax.broadcasted_iota(jnp.int32, (chunk_rows, _LANES), axis)
        return (idx & k) != 0

    # Static stage list: (shift, axis_size, axis, predicate-or-None).
    stages = []
    k = 1
    while k < _LANES:
        if lane_mask & k:
            stages.append((k, _LANES, 1, None if 2 * k == _LANES else bit_pred(1, k)))
        k *= 2
    k = 1
    while k < chunk_rows:
        if sub_mask & k:
            stages.append((k, chunk_rows, 0,
                           None if 2 * k == chunk_rows else bit_pred(0, k)))
        k *= 2

    def do_chunk(ci):
        static = isinstance(ci, int)
        src = ci * chunk_rows if static else pl.multiple_of(ci * chunk_rows, chunk_rows)
        v = x_ref[pl.ds(src, chunk_rows), :]
        for k, size, axis, pred in stages:
            if pred is None:
                # Rotating by half the extent == complementing the top bit.
                v = pltpu.roll(v, k, axis)
            else:
                v = jnp.where(pred, pltpu.roll(v, k, axis),
                              pltpu.roll(v, size - k, axis))
        dj = ci ^ chunk_mask
        dst = dj * chunk_rows if static else pl.multiple_of(dj * chunk_rows, chunk_rows)
        o_ref[pl.ds(dst, chunk_rows), :] = v

    if n_chunks <= 8:
        for ci in range(n_chunks):           # fully static: static slices/offsets
            do_chunk(ci)
    else:
        def body(ci, carry):
            do_chunk(ci)
            return carry
        jax.lax.fori_loop(0, n_chunks, body, 0, unroll=8)


def _flip_kernel(scal_ref, x_ref, o_ref, *, b_axis, dims, chunk_rows, n_chunks):
    """One (r-block, batch, channel) step on a (r_block, 128) lane-dense slab."""
    d, h, w = dims
    b = pl.program_id(b_axis)
    combo = scal_ref[2 * b + 1]              # flip_D*4 + flip_H*2 + flip_W

    copy_combos = [0]
    flip_combos = []
    for ci in range(1, 8):
        fd, fh, fw = (ci >> 2) & 1, (ci >> 1) & 1, ci & 1
        lm, sm, cm = _static_masks(fd, fh, fw, d, h, w, chunk_rows, n_chunks)
        if lm == 0 and sm == 0 and cm == 0:
            copy_combos.append(ci)           # flip fully handled by the index_map
        else:
            flip_combos.append((ci, lm, sm, cm))

    is_copy = combo == copy_combos[0]
    for ci in copy_combos[1:]:
        is_copy = jnp.logical_or(is_copy, combo == ci)

    @pl.when(is_copy)
    def _():
        o_ref[...] = x_ref[...]              # full-bandwidth block copy

    for ci, lm, sm, cm in flip_combos:
        @pl.when(combo == ci)
        def _(lm=lm, sm=sm, cm=cm):
            _apply_flip(x_ref, o_ref, lm, sm, cm, chunk_rows, n_chunks)


def random_volume_flip_batch(x, to_flip, p=0.7):
    """Pallas implementation of DataAugmentation.forward (input_type='volume').

    x:       [B, C, D, H, W]  -- every instance gets its own flip decision.
    to_flip: [B] uniform(0, 1) samples (one torch.rand(1) per instance).
    Returns (augmented volume, per-instance (flip_D, flip_H, flip_W) flags).
    """
    B, C, D, H, W = x.shape
    for n, name in ((D, "D"), (H, "H"), (W, "W")):
        # TODO(synk): non-power-of-two spatial dims would need a padded/sliced
        # reversal path; the XOR trick assumes power-of-two extents.
        assert n & (n - 1) == 0, f"{name}={n} must be a power of two"
    total = D * H * W
    assert total % _LANES == 0, "D*H*W must be a multiple of 128"

    itemsize = jnp.dtype(x.dtype).itemsize
    R = total // _LANES                                  # rows of 128 lanes
    sub_rows = max(8, 32 // itemsize)                    # min sublane tile: 8/16/32
    target_rows = max(sub_rows, (512 * 1024) // (_LANES * itemsize))  # ~512 KiB blocks
    r_block = min(R, target_rows)                        # power of two; mult of tile or == R
    chunk_rows = min(sub_rows, r_block)
    n_chunks = r_block // chunk_rows
    nb = R // r_block

    flags = _flip_flags(to_flip, p)                      # (B, 3) int32: (D, H, W)
    mask = (flags[:, 2] * (W - 1) + flags[:, 1] * (H - 1) * W
            + flags[:, 0] * (D - 1) * H * W).astype(jnp.int32)
    blk_xor = mask >> (7 + r_block.bit_length() - 1)     # block-level flip bits
    combo = flags[:, 0] * 4 + flags[:, 1] * 2 + flags[:, 2]
    scal = jnp.stack([blk_xor, combo], axis=1).reshape(-1).astype(jnp.int32)  # (2B,)

    x2 = x.reshape(B, C, R, _LANES)                      # free reshape of contiguous HBM

    # Order the grid largest-axis-first so megacore (v7x) splits evenly.
    sizes = {"b": B, "c": C, "r": nb}
    order = sorted(sizes, key=lambda k: -sizes[k])
    pos = {name: i for i, name in enumerate(order)}
    grid = tuple(sizes[name] for name in order)

    def in_map(g0, g1, g2, scal_ref):
        g = (g0, g1, g2)
        b, c, r = g[pos["b"]], g[pos["c"]], g[pos["r"]]
        return (b, c, r ^ scal_ref[2 * b], 0)            # block-index XOR = free flip

    def out_map(g0, g1, g2, scal_ref):
        del scal_ref
        g = (g0, g1, g2)
        return (g[pos["b"]], g[pos["c"]], g[pos["r"]], 0)

    kernel = functools.partial(
        _flip_kernel, b_axis=pos["b"], dims=(D, H, W),
        chunk_rows=chunk_rows, n_chunks=n_chunks)

    grid_spec = pltpu.PrefetchScalarGridSpec(
        num_scalar_prefetch=1,                           # [blk_xor, combo] per instance
        grid=grid,
        in_specs=[pl.BlockSpec((None, None, r_block, _LANES), in_map)],
        out_specs=pl.BlockSpec((None, None, r_block, _LANES), out_map),
    )

    out = pl.pallas_call(
        kernel,
        out_shape=jax.ShapeDtypeStruct((B, C, R, _LANES), x.dtype),
        grid_spec=grid_spec,
        compiler_params=pltpu.CompilerParams(
            dimension_semantics=("parallel", "parallel", "parallel")),
    )(scal, x2)

    return out.reshape(B, C, D, H, W), flags


def data_augmentation_forward(x, key, input_type="volume"):
    """DataAugmentation.forward analogue: per-instance RandomVolumeFlip(p=0.7)."""
    if input_type != "volume":
        raise ValueError("only input_type='volume' has an augmentation pipeline")
    to_flip = jax.random.uniform(key, (x.shape[0],))
    out, _ = random_volume_flip_batch(x, to_flip, p=0.7)
    return out


if __name__ == "__main__":
    key = jax.random.PRNGKey(0)
    k_vol, k_aug = jax.random.split(key)

    B, C, D, H, W = 2, 4, 8, 16, 16
    x = jax.random.normal(k_vol, (B, C, D, H, W), dtype=jnp.float32)

    fwd = jax.jit(functools.partial(random_volume_flip_batch, p=0.7))

    # Deterministic sweep exercising every flip bucket (p=0.7 -> 0.1-wide
    # buckets) plus the no-flip path; each batch element draws independently.
    test_to_flip = [jnp.array([0.05, 0.75]),   # flip [D]     , no flip
                    jnp.array([0.15, 0.25]),   # flip [H]     , flip [W]
                    jnp.array([0.35, 0.45]),   # flip [D, H]  , flip [D, W]
                    jnp.array([0.55, 0.65])]   # flip [H, W]  , flip [D, H, W]

    for to_flip in test_to_flip:
        out, flags = fwd(x, to_flip)
        out = jax.block_until_ready(out)

        # Pure-JAX reference with the same per-instance flags.
        ref = []
        for i in range(B):
            v = x[i]
            v = jnp.where(flags[i, 0] == 1, jnp.flip(v, axis=1), v)
            v = jnp.where(flags[i, 1] == 1, jnp.flip(v, axis=2), v)
            v = jnp.where(flags[i, 2] == 1, jnp.flip(v, axis=3), v)
            ref.append(v)
        ref = jnp.stack(ref)

        assert out.shape == x.shape and out.dtype == x.dtype
        assert jnp.array_equal(out, ref), "mismatch vs reference flip"

    # Also run the module-style randomized forward once (torch.rand analogue).
    aug = jax.block_until_ready(data_augmentation_forward(x, k_aug))
    assert aug.shape == x.shape

    print("KERNEL_OK")
</pallas_src>

<mosaic_0001>
module attributes {stable_mosaic.version = 11 : i64} {
  func.func @_flip_kernel(%arg0: i32, %arg1: i32, %arg2: i32, %arg3: memref<4xi32, #tpu.memory_space<smem>>, %arg4: memref<1x1x16x128xf32, #tpu.memory_space<vmem>>, %arg5: memref<1x1x16x128xf32, #tpu.memory_space<vmem>>) attributes {dimension_semantics = [#tpu.dimension_semantics<parallel>, #tpu.dimension_semantics<parallel>, #tpu.dimension_semantics<parallel>], iteration_bounds = array<i64: 4, 2, 1>, scalar_prefetch = 1 : i64, scratch_operands = 0 : i64, tpu.core_type = #tpu.core_type<tc>, window_params = [{transform_indices = @transform_0, window_bounds = array<i64: 1, 1, 16, 128>}, {transform_indices = @transform_1, window_bounds = array<i64: 1, 1, 16, 128>}]} {
    %c2_i32 = arith.constant 2 : i32
    %0 = arith.muli %c2_i32, %arg1 : i32
    %c1_i32 = arith.constant 1 : i32
    %1 = arith.addi %0, %c1_i32 : i32
    %2 = arith.index_cast %1 : i32 to index
    %3 = memref.load %arg3[%2] : memref<4xi32, #tpu.memory_space<smem>>
    %c0_i32 = arith.constant 0 : i32
    %4 = arith.cmpi eq, %3, %c0_i32 : i32
    %5 = arith.extui %4 : i1 to i32
    %c0_i32_0 = arith.constant 0 : i32
    %6 = arith.cmpi ne, %5, %c0_i32_0 : i32
    scf.if %6 {
      %c0 = arith.constant 0 : index
      %c0_10 = arith.constant 0 : index
      %c0_11 = arith.constant 0 : index
      %c0_12 = arith.constant 0 : index
      %28 = vector.load %arg4[%c0, %c0_10, %c0_11, %c0_12] : memref<1x1x16x128xf32, #tpu.memory_space<vmem>>, vector<1x1x16x128xf32>
      %29 = vector.shape_cast %28 : vector<1x1x16x128xf32> to vector<16x128xf32>
      %c0_13 = arith.constant 0 : index
      %c0_14 = arith.constant 0 : index
      %c0_15 = arith.constant 0 : index
      %c0_16 = arith.constant 0 : index
      %30 = vector.load %arg5[%c0_13, %c0_14, %c0_15, %c0_16] : memref<1x1x16x128xf32, #tpu.memory_space<vmem>>, vector<1x1x16x128xf32>
      %31 = vector.shape_cast %30 : vector<1x1x16x128xf32> to vector<16x128xf32>
      %32 = vector.shape_cast %29 : vector<16x128xf32> to vector<1x1x16x128xf32>
      tpu.vector_store %arg5[%c0_13, %c0_14, %c0_15, %c0_16], %32 {strides = array<i32>} : memref<1x1x16x128xf32, #tpu.memory_space<vmem>>, vector<1x1x16x128xf32>,
    } else {
    }
    %c1_i32_1 = arith.constant 1 : i32
    %7 = arith.cmpi eq, %3, %c1_i32_1 : i32
    %8 = arith.extui %7 : i1 to i32
    %c0_i32_2 = arith.constant 0 : i32
    %9 = arith.cmpi ne, %8, %c0_i32_2 : i32
    scf.if %9 {
      %28 = tpu.iota {dimensions = array<i32: 1>} : vector<8x128xi32>
      %c1_i32_10 = arith.constant 1 : i32
      %29 = vector.broadcast %c1_i32_10 : i32 to vector<8x128xi32>
      %30 = arith.andi %28, %29 : vector<8x128xi32>
      %c0_i32_11 = arith.constant 0 : i32
      %31 = vector.broadcast %c0_i32_11 : i32 to vector<8x128xi32>
      %32 = arith.cmpi ne, %30, %31 : vector<8x128xi32>
      %33 = tpu.iota {dimensions = array<i32: 1>} : vector<8x128xi32>
      %c2_i32_12 = arith.constant 2 : i32
      %34 = vector.broadcast %c2_i32_12 : i32 to vector<8x128xi32>
      %35 = arith.andi %33, %34 : vector<8x128xi32>
      %c0_i32_13 = arith.constant 0 : i32
      %36 = vector.broadcast %c0_i32_13 : i32 to vector<8x128xi32>
      %37 = arith.cmpi ne, %35, %36 : vector<8x128xi32>
      %38 = tpu.iota {dimensions = array<i32: 1>} : vector<8x128xi32>
      %c4_i32_14 = arith.constant 4 : i32
      %39 = vector.broadcast %c4_i32_14 : i32 to vector<8x128xi32>
      %40 = arith.andi %38, %39 : vector<8x128xi32>
      %c0_i32_15 = arith.constant 0 : i32
      %41 = vector.broadcast %c0_i32_15 : i32 to vector<8x128xi32>
      %42 = arith.cmpi ne, %40, %41 : vector<8x128xi32>
      %43 = tpu.iota {dimensions = array<i32: 1>} : vector<8x128xi32>
      %c8_i32 = arith.constant 8 : i32
      %44 = vector.broadcast %c8_i32 : i32 to vector<8x128xi32>
      %45 = arith.andi %43, %44 : vector<8x128xi32>
      %c0_i32_16 = arith.constant 0 : i32
      %46 = vector.broadcast %c0_i32_16 : i32 to vector<8x128xi32>
      %47 = arith.cmpi ne, %45, %46 : vector<8x128xi32>
      %c0 = arith.constant 0 : index
      %c0_17 = arith.constant 0 : index
      %c0_18 = arith.constant 0 : index
      %c0_19 = arith.constant 0 : index
      %48 = vector.load %arg4[%c0, %c0_17, %c0_18, %c0_19] : memref<1x1x16x128xf32, #tpu.memory_space<vmem>>, vector<1x1x8x128xf32>
      %49 = vector.shape_cast %48 : vector<1x1x8x128xf32> to vector<8x128xf32>
      %c1_i32_20 = arith.constant 1 : i32
      %50 = tpu.dynamic_rotate %49 by %c1_i32_20 dim 1 : vector<8x128xf32>, i32 -> vector<8x128xf32>
      %c127_i32 = arith.constant 127 : i32
      %51 = tpu.dynamic_rotate %49 by %c127_i32 dim 1 : vector<8x128xf32>, i32 -> vector<8x128xf32>
      %52 = arith.select %32, %50, %51 : vector<8x128xi1>, vector<8x128xf32>
      %c2_i32_21 = arith.constant 2 : i32
      %53 = tpu.dynamic_rotate %52 by %c2_i32_21 dim 1 : vector<8x128xf32>, i32 -> vector<8x128xf32>
      %c126_i32 = arith.constant 126 : i32
      %54 = tpu.dynamic_rotate %52 by %c126_i32 dim 1 : vector<8x128xf32>, i32 -> vector<8x128xf32>
      %55 = arith.select %37, %53, %54 : vector<8x128xi1>, vector<8x128xf32>
      %c4_i32_22 = arith.constant 4 : i32
      %56 = tpu.dynamic_rotate %55 by %c4_i32_22 dim 1 : vector<8x128xf32>, i32 -> vector<8x128xf32>
      %c124_i32 = arith.constant 124 : i32
      %57 = tpu.dynamic_rotate %55 by %c124_i32 dim 1 : vector<8x128xf32>, i32 -> vector<8x128xf32>
      %58 = arith.select %42, %56, %57 : vector<8x128xi1>, vector<8x128xf32>
      %c8_i32_23 = arith.constant 8 : i32
      %59 = tpu.dynamic_rotate %58 by %c8_i32_23 dim 1 : vector<8x128xf32>, i32 -> vector<8x128xf32>
      %c120_i32 = arith.constant 120 : i32
      %60 = tpu.dynamic_rotate %58 by %c120_i32 dim 1 : vector<8x128xf32>, i32 -> vector<8x128xf32>
      %61 = arith.select %47, %59, %60 : vector<8x128xi1>, vector<8x128xf32>
      %c0_24 = arith.constant 0 : index
      %c0_25 = arith.constant 0 : index
      %c0_26 = arith.constant 0 : index
      %c0_27 = arith.constant 0 : index
      %62 = vector.load %arg5[%c0_24, %c0_25, %c0_26, %c0_27] : memref<1x1x16x128xf32, #tpu.memory_space<vmem>>, vector<1x1x8x128xf32>
      %63 = vector.shape_cast %62 : vector<1x1x8x128xf32> to vector<8x128xf32>
      %64 = vector.shape_cast %61 : vector<8x128xf32> to vector<1x1x8x128xf32>
      tpu.vector_store %arg5[%c0_24, %c0_25, %c0_26, %c0_27], %64 {strides = array<i32>} : memref<1x1x16x128xf32, #tpu.memory_space<vmem>>, vector<1x1x8x128xf32>,
      %c0_28 = arith.constant 0 : index
      %c0_29 = arith.constant 0 : index
      %c8 = arith.constant 8 : index
      %c0_30 = arith.constant 0 : index
      %65 = vector.load %arg4[%c0_28, %c0_29, %c8, %c0_30] : memref<1x1x16x128xf32, #tpu.memory_space<vmem>>, vector<1x1x8x128xf32>
      %66 = vector.shape_cast %65 : vector<1x1x8x128xf32> to vector<8x128xf32>
      %c1_i32_31 = arith.constant 1 : i32
      %67 = tpu.dynamic_rotate %66 by %c1_i32_31 dim 1 : vector<8x128xf32>, i32 -> vector<8x128xf32>
      %c127_i32_32 = arith.constant 127 : i32
      %68 = tpu.dynamic_rotate %66 by %c127_i32_32 dim 1 : vector<8x128xf32>, i32 -> vector<8x128xf32>
      %69 = arith.select %32, %67, %68 : vector<8x128xi1>, vector<8x128xf32>
      %c2_i32_33 = arith.constant 2 : i32
      %70 = tpu.dynamic_rotate %69 by %c2_i32_33 dim 1 : vector<8x128xf32>, i32 -> vector<8x128xf32>
      %c126_i32_34 = arith.constant 126 : i32
      %71 = tpu.dynamic_rotate %69 by %c126_i32_34 dim 1 : vector<8x128xf32>, i32 -> vector<8x128xf32>
      %72 = arith.select %37, %70, %71 : vector<8x128xi1>, vector<8x128xf32>
      %c4_i32_35 = arith.constant 4 : i32
      %73 = tpu.dynamic_rotate %72 by %c4_i32_35 dim 1 : vector<8x128xf32>, i32 -> vector<8x128xf32>
      %c124_i32_36 = arith.constant 124 : i32
      %74 = tpu.dynamic_rotate %72 by %c124_i32_36 dim 1 : vector<8x128xf32>, i32 -> vector<8x128xf32>
      %75 = arith.select %42, %73, %74 : vector<8x128xi1>, vector<8x128xf32>
      %c8_i32_37 = arith.constant 8 : i32
      %76 = tpu.dynamic_rotate %75 by %c8_i32_37 dim 1 : vector<8x128xf32>, i32 -> vector<8x128xf32>
      %c120_i32_38 = arith.constant 120 : i32
      %77 = tpu.dynamic_rotate %75 by %c120_i32_38 dim 1 : vector<8x128xf32>, i32 -> vector<8x128xf32>
      %78 = arith.select %47, %76, %77 : vector<8x128xi1>, vector<8x128xf32>
      %c0_39 = arith.constant 0 : index
      %c0_40 = arith.constant 0 : index
      %c8_41 = arith.constant 8 : index
      %c0_42 = arith.constant 0 : index
      %79 = vector.load %arg5[%c0_39, %c0_40, %c8_41, %c0_42] : memref<1x1x16x128xf32, #tpu.memory_space<vmem>>, vector<1x1x8x128xf32>
      %80 = vector.shape_cast %79 : vector<1x1x8x128xf32> to vector<8x128xf32>
      %81 = vector.shape_cast %78 : vector<8x128xf32> to vector<1x1x8x128xf32>
      tpu.vector_store %arg5[%c0_39, %c0_40, %c8_41, %c0_42], %81 {strides = array<i32>} : memref<1x1x16x128xf32, #tpu.memory_space<vmem>>, vector<1x1x8x128xf32>,
    } else {
    }
    %c2_i32_3 = arith.constant 2 : i32
    %10 = arith.cmpi eq, %3, %c2_i32_3 : i32
    %11 = arith.extui %10 : i1 to i32
    %c0_i32_4 = arith.constant 0 : i32
    %12 = arith.cmpi ne, %11, %c0_i32_4 : i32
    scf.if %12 {
      %28 = tpu.iota {dimensions = array<i32: 1>} : vector<8x128xi32>
      %c16_i32 = arith.constant 16 : i32
      %29 = vector.broadcast %c16_i32 : i32 to vector<8x128xi32>
      %30 = arith.andi %28, %29 : vector<8x128xi32>
      %c0_i32_10 = arith.constant 0 : i32
      %31 = vector.broadcast %c0_i32_10 : i32 to vector<8x128xi32>
      %32 = arith.cmpi ne, %30, %31 : vector<8x128xi32>
      %33 = tpu.iota {dimensions = array<i32: 1>} : vector<8x128xi32>
      %c32_i32 = arith.constant 32 : i32
      %34 = vector.broadcast %c32_i32 : i32 to vector<8x128xi32>
      %35 = arith.andi %33, %34 : vector<8x128xi32>
      %c0_i32_11 = arith.constant 0 : i32
      %36 = vector.broadcast %c0_i32_11 : i32 to vector<8x128xi32>
      %37 = arith.cmpi ne, %35, %36 : vector<8x128xi32>
      %38 = tpu.iota {dimensions = array<i32: 0>} : vector<8x128xi32>
      %c1_i32_12 = arith.constant 1 : i32
      %39 = vector.broadcast %c1_i32_12 : i32 to vector<8x128xi32>
      %40 = arith.andi %38, %39 : vector<8x128xi32>
      %c0_i32_13 = arith.constant 0 : i32
      %41 = vector.broadcast %c0_i32_13 : i32 to vector<8x128xi32>
      %42 = arith.cmpi ne, %40, %41 : vector<8x128xi32>
      %c0 = arith.constant 0 : index
      %c0_14 = arith.constant 0 : index
      %c0_15 = arith.constant 0 : index
      %c0_16 = arith.constant 0 : index
      %43 = vector.load %arg4[%c0, %c0_14, %c0_15, %c0_16] : memref<1x1x16x128xf32, #tpu.memory_space<vmem>>, vector<1x1x8x128xf32>
      %44 = vector.shape_cast %43 : vector<1x1x8x128xf32> to vector<8x128xf32>
      %c16_i32_17 = arith.constant 16 : i32
      %45 = tpu.dynamic_rotate %44 by %c16_i32_17 dim 1 : vector<8x128xf32>, i32 -> vector<8x128xf32>
      %c112_i32 = arith.constant 112 : i32
      %46 = tpu.dynamic_rotate %44 by %c112_i32 dim 1 : vector<8x128xf32>, i32 -> vector<8x128xf32>
      %47 = arith.select %32, %45, %46 : vector<8x128xi1>, vector<8x128xf32>
      %c32_i32_18 = arith.constant 32 : i32
      %48 = tpu.dynamic_rotate %47 by %c32_i32_18 dim 1 : vector<8x128xf32>, i32 -> vector<8x128xf32>
      %c96_i32 = arith.constant 96 : i32
      %49 = tpu.dynamic_rotate %47 by %c96_i32 dim 1 : vector<8x128xf32>, i32 -> vector<8x128xf32>
      %50 = arith.select %37, %48, %49 : vector<8x128xi1>, vector<8x128xf32>
      %c64_i32 = arith.constant 64 : i32
      %51 = tpu.dynamic_rotate %50 by %c64_i32 dim 1 : vector<8x128xf32>, i32 -> vector<8x128xf32>
      %c1_i32_19 = arith.constant 1 : i32
      %52 = tpu.dynamic_rotate %51 by %c1_i32_19 dim 0 : vector<8x128xf32>, i32 -> vector<8x128xf32>
      %c7_i32_20 = arith.constant 7 : i32
      %53 = tpu.dynamic_rotate %51 by %c7_i32_20 dim 0 : vector<8x128xf32>, i32 -> vector<8x128xf32>
      %54 = arith.select %42, %52, %53 : vector<8x128xi1>, vector<8x128xf32>
      %c0_21 = arith.constant 0 : index
      %c0_22 = arith.constant 0 : index
      %c0_23 = arith.constant 0 : index
      %c0_24 = arith.constant 0 : index
      %55 = vector.load %arg5[%c0_21, %c0_22, %c0_23, %c0_24] : memref<1x1x16x128xf32, #tpu.memory_space<vmem>>, vector<1x1x8x128xf32>
      %56 = vector.shape_cast %55 : vector<1x1x8x128xf32> to vector<8x128xf32>
      %57 = vector.shape_cast %54 : vector<8x128xf32> to vector<1x1x8x128xf32>
      tpu.vector_store %arg5[%c0_21, %c0_22, %c0_23, %c0_24], %57 {strides = array<i32>} : memref<1x1x16x128xf32, #tpu.memory_space<vmem>>, vector<1x1x8x128xf32>,
      %c0_25 = arith.constant 0 : index
      %c0_26 = arith.constant 0 : index
      %c8 = arith.constant 8 : index
      %c0_27 = arith.constant 0 : index
      %58 = vector.load %arg4[%c0_25, %c0_26, %c8, %c0_27] : memref<1x1x16x128xf32, #tpu.memory_space<vmem>>, vector<1x1x8x128xf32>
      %59 = vector.shape_cast %58 : vector<1x1x8x128xf32> to vector<8x128xf32>
      %c16_i32_28 = arith.constant 16 : i32
      %60 = tpu.dynamic_rotate %59 by %c16_i32_28 dim 1 : vector<8x128xf32>, i32 -> vector<8x128xf32>
      %c112_i32_29 = arith.constant 112 : i32
      %61 = tpu.dynamic_rotate %59 by %c112_i32_29 dim 1 : vector<8x128xf32>, i32 -> vector<8x128xf32>
      %62 = arith.select %32, %60, %61 : vector<8x128xi1>, vector<8x128xf32>
      %c32_i32_30 = arith.constant 32 : i32
      %63 = tpu.dynamic_rotate %62 by %c32_i32_30 dim 1 : vector<8x128xf32>, i32 -> vector<8x128xf32>
      %c96_i32_31 = arith.constant 96 : i32
      %64 = tpu.dynamic_rotate %62 by %c96_i32_31 dim 1 : vector<8x128xf32>, i32 -> vector<8x128xf32>
      %65 = arith.select %37, %63, %64 : vector<8x128xi1>, vector<8x128xf32>
      %c64_i32_32 = arith.constant 64 : i32
      %66 = tpu.dynamic_rotate %65 by %c64_i32_32 dim 1 : vector<8x128xf32>, i32 -> vector<8x128xf32>
      %c1_i32_33 = arith.constant 1 : i32
      %67 = tpu.dynamic_rotate %66 by %c1_i32_33 dim 0 : vector<8x128xf32>, i32 -> vector<8x128xf32>
      %c7_i32_34 = arith.constant 7 : i32
      %68 = tpu.dynamic_rotate %66 by %c7_i32_34 dim 0 : vector<8x128xf32>, i32 -> vector<8x128xf32>
      %69 = arith.select %42, %67, %68 : vector<8x128xi1>, vector<8x128xf32>
      %c0_35 = arith.constant 0 : index
      %c0_36 = arith.constant 0 : index
      %c8_37 = arith.constant 8 : index
      %c0_38 = arith.constant 0 : index
      %70 = vector.load %arg5[%c0_35, %c0_36, %c8_37, %c0_38] : memref<1x1x16x128xf32, #tpu.memory_space<vmem>>, vector<1x1x8x128xf32>
      %71 = vector.shape_cast %70 : vector<1x1x8x128xf32> to vector<8x128xf32>
      %72 = vector.shape_cast %69 : vector<8x128xf32> to vector<1x1x8x128xf32>
      tpu.vector_store %arg5[%c0_35, %c0_36, %c8_37, %c0_38], %72 {strides = array<i32>} : memref<1x1x16x128xf32, #tpu.memory_space<vmem>>, vector<1x1x8x128xf32>,
    } else {
    }
    %c3_i32 = arith.constant 3 : i32
    %13 = arith.cmpi eq, %3, %c3_i32 : i32
    %14 = arith.extui %13 : i1 to i32
    %c0_i32_5 = arith.constant 0 : i32
    %15 = arith.cmpi ne, %14, %c0_i32_5 : i32
    scf.if %15 {
      %28 = tpu.iota {dimensions = array<i32: 1>} : vector<8x128xi32>
      %c1_i32_10 = arith.constant 1 : i32
      %29 = vector.broadcast %c1_i32_10 : i32 to vector<8x128xi32>
      %30 = arith.andi %28, %29 : vector<8x128xi32>
      %c0_i32_11 = arith.constant 0 : i32
      %31 = vector.broadcast %c0_i32_11 : i32 to vector<8x128xi32>
      %32 = arith.cmpi ne, %30, %31 : vector<8x128xi32>
      %33 = tpu.iota {dimensions = array<i32: 1>} : vector<8x128xi32>
      %c2_i32_12 = arith.constant 2 : i32
      %34 = vector.broadcast %c2_i32_12 : i32 to vector<8x128xi32>
      %35 = arith.andi %33, %34 : vector<8x128xi32>
      %c0_i32_13 = arith.constant 0 : i32
      %36 = vector.broadcast %c0_i32_13 : i32 to vector<8x128xi32>
      %37 = arith.cmpi ne, %35, %36 : vector<8x128xi32>
      %38 = tpu.iota {dimensions = array<i32: 1>} : vector<8x128xi32>
      %c4_i32_14 = arith.constant 4 : i32
      %39 = vector.broadcast %c4_i32_14 : i32 to vector<8x128xi32>
      %40 = arith.andi %38, %39 : vector<8x128xi32>
      %c0_i32_15 = arith.constant 0 : i32
      %41 = vector.broadcast %c0_i32_15 : i32 to vector<8x128xi32>
      %42 = arith.cmpi ne, %40, %41 : vector<8x128xi32>
      %43 = tpu.iota {dimensions = array<i32: 1>} : vector<8x128xi32>
      %c8_i32 = arith.constant 8 : i32
      %44 = vector.broadcast %c8_i32 : i32 to vector<8x128xi32>
      %45 = arith.andi %43, %44 : vector<8x128xi32>
      %c0_i32_16 = arith.constant 0 : i32
      %46 = vector.broadcast %c0_i32_16 : i32 to vector<8x128xi32>
      %47 = arith.cmpi ne, %45, %46 : vector<8x128xi32>
      %48 = tpu.iota {dimensions = array<i32: 1>} : vector<8x128xi32>
      %c16_i32 = arith.constant 16 : i32
      %49 = vector.broadcast %c16_i32 : i32 to vector<8x128xi32>
      %50 = arith.andi %48, %49 : vector<8x128xi32>
      %c0_i32_17 = arith.constant 0 : i32
      %51 = vector.broadcast %c0_i32_17 : i32 to vector<8x128xi32>
      %52 = arith.cmpi ne, %50, %51 : vector<8x128xi32>
      %53 = tpu.iota {dimensions = array<i32: 1>} : vector<8x128xi32>
      %c32_i32 = arith.constant 32 : i32
      %54 = vector.broadcast %c32_i32 : i32 to vector<8x128xi32>
      %55 = arith.andi %53, %54 : vector<8x128xi32>
      %c0_i32_18 = arith.constant 0 : i32
      %56 = vector.broadcast %c0_i32_18 : i32 to vector<8x128xi32>
      %57 = arith.cmpi ne, %55, %56 : vector<8x128xi32>
      %58 = tpu.iota {dimensions = array<i32: 0>} : vector<8x128xi32>
      %c1_i32_19 = arith.constant 1 : i32
      %59 = vector.broadcast %c1_i32_19 : i32 to vector<8x128xi32>
      %60 = arith.andi %58, %59 : vector<8x128xi32>
      %c0_i32_20 = arith.constant 0 : i32
      %61 = vector.broadcast %c0_i32_20 : i32 to vector<8x128xi32>
      %62 = arith.cmpi ne, %60, %61 : vector<8x128xi32>
      %c0 = arith.constant 0 : index
      %c0_21 = arith.constant 0 : index
      %c0_22 = arith.constant 0 : index
      %c0_23 = arith.constant 0 : index
      %63 = vector.load %arg4[%c0, %c0_21, %c0_22, %c0_23] : memref<1x1x16x128xf32, #tpu.memory_space<vmem>>, vector<1x1x8x128xf32>
      %64 = vector.shape_cast %63 : vector<1x1x8x128xf32> to vector<8x128xf32>
      %c1_i32_24 = arith.constant 1 : i32
      %65 = tpu.dynamic_rotate %64 by %c1_i32_24 dim 1 : vector<8x128xf32>, i32 -> vector<8x128xf32>
      %c127_i32 = arith.constant 127 : i32
      %66 = tpu.dynamic_rotate %64 by %c127_i32 dim 1 : vector<8x128xf32>, i32 -> vector<8x128xf32>
      %67 = arith.select %32, %65, %66 : vector<8x128xi1>, vector<8x128xf32>
      %c2_i32_25 = arith.constant 2 : i32
      %68 = tpu.dynamic_rotate %67 by %c2_i32_25 dim 1 : vector<8x128xf32>, i32 -> vector<8x128xf32>
      %c126_i32 = arith.constant 126 : i32
      %69 = tpu.dynamic_rotate %67 by %c126_i32 dim 1 : vector<8x128xf32>, i32 -> vector<8x128xf32>
      %70 = arith.select %37, %68, %69 : vector<8x128xi1>, vector<8x128xf32>
      %c4_i32_26 = arith.constant 4 : i32
      %71 = tpu.dynamic_rotate %70 by %c4_i32_26 dim 1 : vector<8x128xf32>, i32 -> vector<8x128xf32>
      %c124_i32 = arith.constant 124 : i32
      %72 = tpu.dynamic_rotate %70 by %c124_i32 dim 1 : vector<8x128xf32>, i32 -> vector<8x128xf32>
      %73 = arith.select %42, %71, %72 : vector<8x128xi1>, vector<8x128xf32>
      %c8_i32_27 = arith.constant 8 : i32
      %74 = tpu.dynamic_rotate %73 by %c8_i32_27 dim 1 : vector<8x128xf32>, i32 -> vector<8x128xf32>
      %c120_i32 = arith.constant 120 : i32
      %75 = tpu.dynamic_rotate %73 by %c120_i32 dim 1 : vector<8x128xf32>, i32 -> vector<8x128xf32>
      %76 = arith.select %47, %74, %75 : vector<8x128xi1>, vector<8x128xf32>
      %c16_i32_28 = arith.constant 16 : i32
      %77 = tpu.dynamic_rotate %76 by %c16_i32_28 dim 1 : vector<8x128xf32>, i32 -> vector<8x128xf32>
      %c112_i32 = arith.constant 112 : i32
      %78 = tpu.dynamic_rotate %76 by %c112_i32 dim 1 : vector<8x128xf32>, i32 -> vector<8x128xf32>
      %79 = arith.select %52, %77, %78 : vector<8x128xi1>, vector<8x128xf32>
      %c32_i32_29 = arith.constant 32 : i32
      %80 = tpu.dynamic_rotate %79 by %c32_i32_29 dim 1 : vector<8x128xf32>, i32 -> vector<8x128xf32>
      %c96_i32 = arith.constant 96 : i32
      %81 = tpu.dynamic_rotate %79 by %c96_i32 dim 1 : vector<8x128xf32>, i32 -> vector<8x128xf32>
      %82 = arith.select %57, %80, %81 : vector<8x128xi1>, vector<8x128xf32>
      %c64_i32 = arith.constant 64 : i32
      %83 = tpu.dynamic_rotate %82 by %c64_i32 dim 1 : vector<8x128xf32>, i32 -> vector<8x128xf32>
      %c1_i32_30 = arith.constant 1 : i32
      %84 = tpu.dynamic_rotate %83 by %c1_i32_30 dim 0 : vector<8x128xf32>, i32 -> vector<8x128xf32>
      %c7_i32_31 = arith.constant 7 : i32
      %85 = tpu.dynamic_rotate %83 by %c7_i32_31 dim 0 : vector<8x128xf32>, i32 -> vector<8x128xf32>
      %86 = arith.select %62, %84, %85 : vector<8x128xi1>, vector<8x128xf32>
      %c0_32 = arith.constant 0 : index
      %c0_33 = arith.constant 0 : index
      %c0_34 = arith.constant 0 : index
      %c0_35 = arith.constant 0 : index
      %87 = vector.load %arg5[%c0_32, %c0_33, %c0_34, %c0_35] : memref<1x1x16x128xf32, #tpu.memory_space<vmem>>, vector<1x1x8x128xf32>
      %88 = vector.shape_cast %87 : vector<1x1x8x128xf32> to vector<8x128xf32>
      %89 = vector.shape_cast %86 : vector<8x128xf32> to vector<1x1x8x128xf32>
      tpu.vector_store %arg5[%c0_32, %c0_33, %c0_34, %c0_35], %89 {strides = array<i32>} : memref<1x1x16x128xf32, #tpu.memory_space<vmem>>, vector<1x1x8x128xf32>,
      %c0_36 = arith.constant 0 : index
      %c0_37 = arith.constant 0 : index
      %c8 = arith.constant 8 : index
      %c0_38 = arith.constant 0 : index
      %90 = vector.load %arg4[%c0_36, %c0_37, %c8, %c0_38] : memref<1x1x16x128xf32, #tpu.memory_space<vmem>>, vector<1x1x8x128xf32>
      %91 = vector.shape_cast %90 : vector<1x1x8x128xf32> to vector<8x128xf32>
      %c1_i32_39 = arith.constant 1 : i32
      %92 = tpu.dynamic_rotate %91 by %c1_i32_39 dim 1 : vector<8x128xf32>, i32 -> vector<8x128xf32>
      %c127_i32_40 = arith.constant 127 : i32
      %93 = tpu.dynamic_rotate %91 by %c127_i32_40 dim 1 : vector<8x128xf32>, i32 -> vector<8x128xf32>
      %94 = arith.select %32, %92, %93 : vector<8x128xi1>, vector<8x128xf32>
      %c2_i32_41 = arith.constant 2 : i32
      %95 = tpu.dynamic_rotate %94 by %c2_i32_41 dim 1 : vector<8x128xf32>, i32 -> vector<8x128xf32>
      %c126_i32_42 = arith.constant 126 : i32
      %96 = tpu.dynamic_rotate %94 by %c126_i32_42 dim 1 : vector<8x128xf32>, i32 -> vector<8x128xf32>
      %97 = arith.select %37, %95, %96 : vector<8x128xi1>, vector<8x128xf32>
      %c4_i32_43 = arith.constant 4 : i32
      %98 = tpu.dynamic_rotate %97 by %c4_i32_43 dim 1 : vector<8x128xf32>, i32 -> vector<8x128xf32>
      %c124_i32_44 = arith.constant 124 : i32
      %99 = tpu.dynamic_rotate %97 by %c124_i32_44 dim 1 : vector<8x128xf32>, i32 -> vector<8x128xf32>
      %100 = arith.select %42, %98, %99 : vector<8x128xi1>, vector<8x128xf32>
      %c8_i32_45 = arith.constant 8 : i32
      %101 = tpu.dynamic_rotate %100 by %c8_i32_45 dim 1 : vector<8x128xf32>, i32 -> vector<8x128xf32>
      %c120_i32_46 = arith.constant 120 : i32
      %102 = tpu.dynamic_rotate %100 by %c120_i32_46 dim 1 : vector<8x128xf32>, i32 -> vector<8x128xf32>
      %103 = arith.select %47, %101, %102 : vector<8x128xi1>, vector<8x128xf32>
      %c16_i32_47 = arith.constant 16 : i32
      %104 = tpu.dynamic_rotate %103 by %c16_i32_47 dim 1 : vector<8x128xf32>, i32 -> vector<8x128xf32>
      %c112_i32_48 = arith.constant 112 : i32
      %105 = tpu.dynamic_rotate %103 by %c112_i32_48 dim 1 : vector<8x128xf32>, i32 -> vector<8x128xf32>
      %106 = arith.select %52, %104, %105 : vector<8x128xi1>, vector<8x128xf32>
      %c32_i32_49 = arith.constant 32 : i32
      %107 = tpu.dynamic_rotate %106 by %c32_i32_49 dim 1 : vector<8x128xf32>, i32 -> vector<8x128xf32>
      %c96_i32_50 = arith.constant 96 : i32
      %108 = tpu.dynamic_rotate %106 by %c96_i32_50 dim 1 : vector<8x128xf32>, i32 -> vector<8x128xf32>
      %109 = arith.select %57, %107, %108 : vector<8x128xi1>, vector<8x128xf32>
      %c64_i32_51 = arith.constant 64 : i32
      %110 = tpu.dynamic_rotate %109 by %c64_i32_51 dim 1 : vector<8x128xf32>, i32 -> vector<8x128xf32>
      %c1_i32_52 = arith.constant 1 : i32
      %111 = tpu.dynamic_rotate %110 by %c1_i32_52 dim 0 : vector<8x128xf32>, i32 -> vector<8x128xf32>
      %c7_i32_53 = arith.constant 7 : i32
      %112 = tpu.dynamic_rotate %110 by %c7_i32_53 dim 0 : vector<8x128xf32>, i32 -> vector<8x128xf32>
      %113 = arith.select %62, %111, %112 : vector<8x128xi1>, vector<8x128xf32>
      %c0_54 = arith.constant 0 : index
      %c0_55 = arith.constant 0 : index
      %c8_56 = arith.constant 8 : index
      %c0_57 = arith.constant 0 : index
      %114 = vector.load %arg5[%c0_54, %c0_55, %c8_56, %c0_57] : memref<1x1x16x128xf32, #tpu.memory_space<vmem>>, vector<1x1x8x128xf32>
      %115 = vector.shape_cast %114 : vector<1x1x8x128xf32> to vector<8x128xf32>
      %116 = vector.shape_cast %113 : vector<8x128xf32> to vector<1x1x8x128xf32>
      tpu.vector_store %arg5[%c0_54, %c0_55, %c8_56, %c0_57], %116 {strides = array<i32>} : memref<1x1x16x128xf32, #tpu.memory_space<vmem>>, vector<1x1x8x128xf32>,
    } else {
    }
    %c4_i32 = arith.constant 4 : i32
    %16 = arith.cmpi eq, %3, %c4_i32 : i32
    %17 = arith.extui %16 : i1 to i32
    %c0_i32_6 = arith.constant 0 : i32
    %18 = arith.cmpi ne, %17, %c0_i32_6 : i32
    scf.if %18 {
      %28 = tpu.iota {dimensions = array<i32: 0>} : vector<8x128xi32>
      %c2_i32_10 = arith.constant 2 : i32
      %29 = vector.broadcast %c2_i32_10 : i32 to vector<8x128xi32>
      %30 = arith.andi %28, %29 : vector<8x128xi32>
      %c0_i32_11 = arith.constant 0 : i32
      %31 = vector.broadcast %c0_i32_11 : i32 to vector<8x128xi32>
      %32 = arith.cmpi ne, %30, %31 : vector<8x128xi32>
      %c0 = arith.constant 0 : index
      %c0_12 = arith.constant 0 : index
      %c0_13 = arith.constant 0 : index
      %c0_14 = arith.constant 0 : index
      %33 = vector.load %arg4[%c0, %c0_12, %c0_13, %c0_14] : memref<1x1x16x128xf32, #tpu.memory_space<vmem>>, vector<1x1x8x128xf32>
      %34 = vector.shape_cast %33 : vector<1x1x8x128xf32> to vector<8x128xf32>
      %c2_i32_15 = arith.constant 2 : i32
      %35 = tpu.dynamic_rotate %34 by %c2_i32_15 dim 0 : vector<8x128xf32>, i32 -> vector<8x128xf32>
      %c6_i32_16 = arith.constant 6 : i32
      %36 = tpu.dynamic_rotate %34 by %c6_i32_16 dim 0 : vector<8x128xf32>, i32 -> vector<8x128xf32>
      %37 = arith.select %32, %35, %36 : vector<8x128xi1>, vector<8x128xf32>
      %c4_i32_17 = arith.constant 4 : i32
      %38 = tpu.dynamic_rotate %37 by %c4_i32_17 dim 0 : vector<8x128xf32>, i32 -> vector<8x128xf32>
      %c0_18 = arith.constant 0 : index
      %c0_19 = arith.constant 0 : index
      %c8 = arith.constant 8 : index
      %c0_20 = arith.constant 0 : index
      %39 = vector.load %arg5[%c0_18, %c0_19, %c8, %c0_20] : memref<1x1x16x128xf32, #tpu.memory_space<vmem>>, vector<1x1x8x128xf32>
      %40 = vector.shape_cast %39 : vector<1x1x8x128xf32> to vector<8x128xf32>
      %41 = vector.shape_cast %38 : vector<8x128xf32> to vector<1x1x8x128xf32>
      tpu.vector_store %arg5[%c0_18, %c0_19, %c8, %c0_20], %41 {strides = array<i32>} : memref<1x1x16x128xf32, #tpu.memory_space<vmem>>, vector<1x1x8x128xf32>,
      %c0_21 = arith.constant 0 : index
      %c0_22 = arith.constant 0 : index
      %c8_23 = arith.constant 8 : index
      %c0_24 = arith.constant 0 : index
      %42 = vector.load %arg4[%c0_21, %c0_22, %c8_23, %c0_24] : memref<1x1x16x128xf32, #tpu.memory_space<vmem>>, vector<1x1x8x128xf32>
      %43 = vector.shape_cast %42 : vector<1x1x8x128xf32> to vector<8x128xf32>
      %c2_i32_25 = arith.constant 2 : i32
      %44 = tpu.dynamic_rotate %43 by %c2_i32_25 dim 0 : vector<8x128xf32>, i32 -> vector<8x128xf32>
      %c6_i32_26 = arith.constant 6 : i32
      %45 = tpu.dynamic_rotate %43 by %c6_i32_26 dim 0 : vector<8x128xf32>, i32 -> vector<8x128xf32>
      %46 = arith.select %32, %44, %45 : vector<8x128xi1>, vector<8x128xf32>
      %c4_i32_27 = arith.constant 4 : i32
      %47 = tpu.dynamic_rotate %46 by %c4_i32_27 dim 0 : vector<8x128xf32>, i32 -> vector<8x128xf32>
      %c0_28 = arith.constant 0 : index
      %c0_29 = arith.constant 0 : index
      %c0_30 = arith.constant 0 : index
      %c0_31 = arith.constant 0 : index
      %48 = vector.load %arg5[%c0_28, %c0_29, %c0_30, %c0_31] : memref<1x1x16x128xf32, #tpu.memory_space<vmem>>, vector<1x1x8x128xf32>
      %49 = vector.shape_cast %48 : vector<1x1x8x128xf32> to vector<8x128xf32>
      %50 = vector.shape_cast %47 : vector<8x128xf32> to vector<1x1x8x128xf32>
      tpu.vector_store %arg5[%c0_28, %c0_29, %c0_30, %c0_31], %50 {strides = array<i32>} : memref<1x1x16x128xf32, #tpu.memory_space<vmem>>, vector<1x1x8x128xf32>,
    } else {
    }
    %c5_i32 = arith.constant 5 : i32
    %19 = arith.cmpi eq, %3, %c5_i32 : i32
    %20 = arith.extui %19 : i1 to i32
    %c0_i32_7 = arith.constant 0 : i32
    %21 = arith.cmpi ne, %20, %c0_i32_7 : i32
    scf.if %21 {
      %28 = tpu.iota {dimensions = array<i32: 1>} : vector<8x128xi32>
      %c1_i32_10 = arith.constant 1 : i32
      %29 = vector.broadcast %c1_i32_10 : i32 to vector<8x128xi32>
      %30 = arith.andi %28, %29 : vector<8x128xi32>
      %c0_i32_11 = arith.constant 0 : i32
      %31 = vector.broadcast %c0_i32_11 : i32 to vector<8x128xi32>
      %32 = arith.cmpi ne, %30, %31 : vector<8x128xi32>
      %33 = tpu.iota {dimensions = array<i32: 1>} : vector<8x128xi32>
      %c2_i32_12 = arith.constant 2 : i32
      %34 = vector.broadcast %c2_i32_12 : i32 to vector<8x128xi32>
      %35 = arith.andi %33, %34 : vector<8x128xi32>
      %c0_i32_13 = arith.constant 0 : i32
      %36 = vector.broadcast %c0_i32_13 : i32 to vector<8x128xi32>
      %37 = arith.cmpi ne, %35, %36 : vector<8x128xi32>
      %38 = tpu.iota {dimensions = array<i32: 1>} : vector<8x128xi32>
      %c4_i32_14 = arith.constant 4 : i32
      %39 = vector.broadcast %c4_i32_14 : i32 to vector<8x128xi32>
      %40 = arith.andi %38, %39 : vector<8x128xi32>
      %c0_i32_15 = arith.constant 0 : i32
      %41 = vector.broadcast %c0_i32_15 : i32 to vector<8x128xi32>
      %42 = arith.cmpi ne, %40, %41 : vector<8x128xi32>
      %43 = tpu.iota {dimensions = array<i32: 1>} : vector<8x128xi32>
      %c8_i32 = arith.constant 8 : i32
      %44 = vector.broadcast %c8_i32 : i32 to vector<8x128xi32>
      %45 = arith.andi %43, %44 : vector<8x128xi32>
      %c0_i32_16 = arith.constant 0 : i32
      %46 = vector.broadcast %c0_i32_16 : i32 to vector<8x128xi32>
      %47 = arith.cmpi ne, %45, %46 : vector<8x128xi32>
      %48 = tpu.iota {dimensions = array<i32: 0>} : vector<8x128xi32>
      %c2_i32_17 = arith.constant 2 : i32
      %49 = vector.broadcast %c2_i32_17 : i32 to vector<8x128xi32>
      %50 = arith.andi %48, %49 : vector<8x128xi32>
      %c0_i32_18 = arith.constant 0 : i32
      %51 = vector.broadcast %c0_i32_18 : i32 to vector<8x128xi32>
      %52 = arith.cmpi ne, %50, %51 : vector<8x128xi32>
      %c0 = arith.constant 0 : index
      %c0_19 = arith.constant 0 : index
      %c0_20 = arith.constant 0 : index
      %c0_21 = arith.constant 0 : index
      %53 = vector.load %arg4[%c0, %c0_19, %c0_20, %c0_21] : memref<1x1x16x128xf32, #tpu.memory_space<vmem>>, vector<1x1x8x128xf32>
      %54 = vector.shape_cast %53 : vector<1x1x8x128xf32> to vector<8x128xf32>
      %c1_i32_22 = arith.constant 1 : i32
      %55 = tpu.dynamic_rotate %54 by %c1_i32_22 dim 1 : vector<8x128xf32>, i32 -> vector<8x128xf32>
      %c127_i32 = arith.constant 127 : i32
      %56 = tpu.dynamic_rotate %54 by %c127_i32 dim 1 : vector<8x128xf32>, i32 -> vector<8x128xf32>
      %57 = arith.select %32, %55, %56 : vector<8x128xi1>, vector<8x128xf32>
      %c2_i32_23 = arith.constant 2 : i32
      %58 = tpu.dynamic_rotate %57 by %c2_i32_23 dim 1 : vector<8x128xf32>, i32 -> vector<8x128xf32>
      %c126_i32 = arith.constant 126 : i32
      %59 = tpu.dynamic_rotate %57 by %c126_i32 dim 1 : vector<8x128xf32>, i32 -> vector<8x128xf32>
      %60 = arith.select %37, %58, %59 : vector<8x128xi1>, vector<8x128xf32>
      %c4_i32_24 = arith.constant 4 : i32
      %61 = tpu.dynamic_rotate %60 by %c4_i32_24 dim 1 : vector<8x128xf32>, i32 -> vector<8x128xf32>
      %c124_i32 = arith.constant 124 : i32
      %62 = tpu.dynamic_rotate %60 by %c124_i32 dim 1 : vector<8x128xf32>, i32 -> vector<8x128xf32>
      %63 = arith.select %42, %61, %62 : vector<8x128xi1>, vector<8x128xf32>
      %c8_i32_25 = arith.constant 8 : i32
      %64 = tpu.dynamic_rotate %63 by %c8_i32_25 dim 1 : vector<8x128xf32>, i32 -> vector<8x128xf32>
      %c120_i32 = arith.constant 120 : i32
      %65 = tpu.dynamic_rotate %63 by %c120_i32 dim 1 : vector<8x128xf32>, i32 -> vector<8x128xf32>
      %66 = arith.select %47, %64, %65 : vector<8x128xi1>, vector<8x128xf32>
      %c2_i32_26 = arith.constant 2 : i32
      %67 = tpu.dynamic_rotate %66 by %c2_i32_26 dim 0 : vector<8x128xf32>, i32 -> vector<8x128xf32>
      %c6_i32_27 = arith.constant 6 : i32
      %68 = tpu.dynamic_rotate %66 by %c6_i32_27 dim 0 : vector<8x128xf32>, i32 -> vector<8x128xf32>
      %69 = arith.select %52, %67, %68 : vector<8x128xi1>, vector<8x128xf32>
      %c4_i32_28 = arith.constant 4 : i32
      %70 = tpu.dynamic_rotate %69 by %c4_i32_28 dim 0 : vector<8x128xf32>, i32 -> vector<8x128xf32>
      %c0_29 = arith.constant 0 : index
      %c0_30 = arith.constant 0 : index
      %c8 = arith.constant 8 : index
      %c0_31 = arith.constant 0 : index
      %71 = vector.load %arg5[%c0_29, %c0_30, %c8, %c0_31] : memref<1x1x16x128xf32, #tpu.memory_space<vmem>>, vector<1x1x8x128xf32>
      %72 = vector.shape_cast %71 : vector<1x1x8x128xf32> to vector<8x128xf32>
      %73 = vector.shape_cast %70 : vector<8x128xf32> to vector<1x1x8x128xf32>
      tpu.vector_store %arg5[%c0_29, %c0_30, %c8, %c0_31], %73 {strides = array<i32>} : memref<1x1x16x128xf32, #tpu.memory_space<vmem>>, vector<1x1x8x128xf32>,
      %c0_32 = arith.constant 0 : index
      %c0_33 = arith.constant 0 : index
      %c8_34 = arith.constant 8 : index
      %c0_35 = arith.constant 0 : index
      %74 = vector.load %arg4[%c0_32, %c0_33, %c8_34, %c0_35] : memref<1x1x16x128xf32, #tpu.memory_space<vmem>>, vector<1x1x8x128xf32>
      %75 = vector.shape_cast %74 : vector<1x1x8x128xf32> to vector<8x128xf32>
      %c1_i32_36 = arith.constant 1 : i32
      %76 = tpu.dynamic_rotate %75 by %c1_i32_36 dim 1 : vector<8x128xf32>, i32 -> vector<8x128xf32>
      %c127_i32_37 = arith.constant 127 : i32
      %77 = tpu.dynamic_rotate %75 by %c127_i32_37 dim 1 : vector<8x128xf32>, i32 -> vector<8x128xf32>
      %78 = arith.select %32, %76, %77 : vector<8x128xi1>, vector<8x128xf32>
      %c2_i32_38 = arith.constant 2 : i32
      %79 = tpu.dynamic_rotate %78 by %c2_i32_38 dim 1 : vector<8x128xf32>, i32 -> vector<8x128xf32>
      %c126_i32_39 = arith.constant 126 : i32
      %80 = tpu.dynamic_rotate %78 by %c126_i32_39 dim 1 : vector<8x128xf32>, i32 -> vector<8x128xf32>
      %81 = arith.select %37, %79, %80 : vector<8x128xi1>, vector<8x128xf32>
      %c4_i32_40 = arith.constant 4 : i32
      %82 = tpu.dynamic_rotate %81 by %c4_i32_40 dim 1 : vector<8x128xf32>, i32 -> vector<8x128xf32>
      %c124_i32_41 = arith.constant 124 : i32
      %83 = tpu.dynamic_rotate %81 by %c124_i32_41 dim 1 : vector<8x128xf32>, i32 -> vector<8x128xf32>
      %84 = arith.select %42, %82, %83 : vector<8x128xi1>, vector<8x128xf32>
      %c8_i32_42 = arith.constant 8 : i32
      %85 = tpu.dynamic_rotate %84 by %c8_i32_42 dim 1 : vector<8x128xf32>, i32 -> vector<8x128xf32>
      %c120_i32_43 = arith.constant 120 : i32
      %86 = tpu.dynamic_rotate %84 by %c120_i32_43 dim 1 : vector<8x128xf32>, i32 -> vector<8x128xf32>
      %87 = arith.select %47, %85, %86 : vector<8x128xi1>, vector<8x128xf32>
      %c2_i32_44 = arith.constant 2 : i32
      %88 = tpu.dynamic_rotate %87 by %c2_i32_44 dim 0 : vector<8x128xf32>, i32 -> vector<8x128xf32>
      %c6_i32_45 = arith.constant 6 : i32
      %89 = tpu.dynamic_rotate %87 by %c6_i32_45 dim 0 : vector<8x128xf32>, i32 -> vector<8x128xf32>
      %90 = arith.select %52, %88, %89 : vector<8x128xi1>, vector<8x128xf32>
      %c4_i32_46 = arith.constant 4 : i32
      %91 = tpu.dynamic_rotate %90 by %c4_i32_46 dim 0 : vector<8x128xf32>, i32 -> vector<8x128xf32>
      %c0_47 = arith.constant 0 : index
      %c0_48 = arith.constant 0 : index
      %c0_49 = arith.constant 0 : index
      %c0_50 = arith.constant 0 : index
      %92 = vector.load %arg5[%c0_47, %c0_48, %c0_49, %c0_50] : memref<1x1x16x128xf32, #tpu.memory_space<vmem>>, vector<1x1x8x128xf32>
      %93 = vector.shape_cast %92 : vector<1x1x8x128xf32> to vector<8x128xf32>
      %94 = vector.shape_cast %91 : vector<8x128xf32> to vector<1x1x8x128xf32>
      tpu.vector_store %arg5[%c0_47, %c0_48, %c0_49, %c0_50], %94 {strides = array<i32>} : memref<1x1x16x128xf32, #tpu.memory_space<vmem>>, vector<1x1x8x128xf32>,
    } else {
    }
    %c6_i32 = arith.constant 6 : i32
    %22 = arith.cmpi eq, %3, %c6_i32 : i32
    %23 = arith.extui %22 : i1 to i32
    %c0_i32_8 = arith.constant 0 : i32
    %24 = arith.cmpi ne, %23, %c0_i32_8 : i32
    scf.if %24 {
      %28 = tpu.iota {dimensions = array<i32: 1>} : vector<8x128xi32>
      %c16_i32 = arith.constant 16 : i32
      %29 = vector.broadcast %c16_i32 : i32 to vector<8x128xi32>
      %30 = arith.andi %28, %29 : vector<8x128xi32>
      %c0_i32_10 = arith.constant 0 : i32
      %31 = vector.broadcast %c0_i32_10 : i32 to vector<8x128xi32>
      %32 = arith.cmpi ne, %30, %31 : vector<8x128xi32>
      %33 = tpu.iota {dimensions = array<i32: 1>} : vector<8x128xi32>
      %c32_i32 = arith.constant 32 : i32
      %34 = vector.broadcast %c32_i32 : i32 to vector<8x128xi32>
      %35 = arith.andi %33, %34 : vector<8x128xi32>
      %c0_i32_11 = arith.constant 0 : i32
      %36 = vector.broadcast %c0_i32_11 : i32 to vector<8x128xi32>
      %37 = arith.cmpi ne, %35, %36 : vector<8x128xi32>
      %38 = tpu.iota {dimensions = array<i32: 0>} : vector<8x128xi32>
      %c1_i32_12 = arith.constant 1 : i32
      %39 = vector.broadcast %c1_i32_12 : i32 to vector<8x128xi32>
      %40 = arith.andi %38, %39 : vector<8x128xi32>
      %c0_i32_13 = arith.constant 0 : i32
      %41 = vector.broadcast %c0_i32_13 : i32 to vector<8x128xi32>
      %42 = arith.cmpi ne, %40, %41 : vector<8x128xi32>
      %43 = tpu.iota {dimensions = array<i32: 0>} : vector<8x128xi32>
      %c2_i32_14 = arith.constant 2 : i32
      %44 = vector.broadcast %c2_i32_14 : i32 to vector<8x128xi32>
      %45 = arith.andi %43, %44 : vector<8x128xi32>
      %c0_i32_15 = arith.constant 0 : i32
      %46 = vector.broadcast %c0_i32_15 : i32 to vector<8x128xi32>
      %47 = arith.cmpi ne, %45, %46 : vector<8x128xi32>
      %c0 = arith.constant 0 : index
      %c0_16 = arith.constant 0 : index
      %c0_17 = arith.constant 0 : index
      %c0_18 = arith.constant 0 : index
      %48 = vector.load %arg4[%c0, %c0_16, %c0_17, %c0_18] : memref<1x1x16x128xf32, #tpu.memory_space<vmem>>, vector<1x1x8x128xf32>
      %49 = vector.shape_cast %48 : vector<1x1x8x128xf32> to vector<8x128xf32>
      %c16_i32_19 = arith.constant 16 : i32
      %50 = tpu.dynamic_rotate %49 by %c16_i32_19 dim 1 : vector<8x128xf32>, i32 -> vector<8x128xf32>
      %c112_i32 = arith.constant 112 : i32
      %51 = tpu.dynamic_rotate %49 by %c112_i32 dim 1 : vector<8x128xf32>, i32 -> vector<8x128xf32>
      %52 = arith.select %32, %50, %51 : vector<8x128xi1>, vector<8x128xf32>
      %c32_i32_20 = arith.constant 32 : i32
      %53 = tpu.dynamic_rotate %52 by %c32_i32_20 dim 1 : vector<8x128xf32>, i32 -> vector<8x128xf32>
      %c96_i32 = arith.constant 96 : i32
      %54 = tpu.dynamic_rotate %52 by %c96_i32 dim 1 : vector<8x128xf32>, i32 -> vector<8x128xf32>
      %55 = arith.select %37, %53, %54 : vector<8x128xi1>, vector<8x128xf32>
      %c64_i32 = arith.constant 64 : i32
      %56 = tpu.dynamic_rotate %55 by %c64_i32 dim 1 : vector<8x128xf32>, i32 -> vector<8x128xf32>
      %c1_i32_21 = arith.constant 1 : i32
      %57 = tpu.dynamic_rotate %56 by %c1_i32_21 dim 0 : vector<8x128xf32>, i32 -> vector<8x128xf32>
      %c7_i32_22 = arith.constant 7 : i32
      %58 = tpu.dynamic_rotate %56 by %c7_i32_22 dim 0 : vector<8x128xf32>, i32 -> vector<8x128xf32>
      %59 = arith.select %42, %57, %58 : vector<8x128xi1>, vector<8x128xf32>
      %c2_i32_23 = arith.constant 2 : i32
      %60 = tpu.dynamic_rotate %59 by %c2_i32_23 dim 0 : vector<8x128xf32>, i32 -> vector<8x128xf32>
      %c6_i32_24 = arith.constant 6 : i32
      %61 = tpu.dynamic_rotate %59 by %c6_i32_24 dim 0 : vector<8x128xf32>, i32 -> vector<8x128xf32>
      %62 = arith.select %47, %60, %61 : vector<8x128xi1>, vector<8x128xf32>
      %c4_i32_25 = arith.constant 4 : i32
      %63 = tpu.dynamic_rotate %62 by %c4_i32_25 dim 0 : vector<8x128xf32>, i32 -> vector<8x128xf32>
      %c0_26 = arith.constant 0 : index
      %c0_27 = arith.constant 0 : index
      %c8 = arith.constant 8 : index
      %c0_28 = arith.constant 0 : index
      %64 = vector.load %arg5[%c0_26, %c0_27, %c8, %c0_28] : memref<1x1x16x128xf32, #tpu.memory_space<vmem>>, vector<1x1x8x128xf32>
      %65 = vector.shape_cast %64 : vector<1x1x8x128xf32> to vector<8x128xf32>
      %66 = vector.shape_cast %63 : vector<8x128xf32> to vector<1x1x8x128xf32>
      tpu.vector_store %arg5[%c0_26, %c0_27, %c8, %c0_28], %66 {strides = array<i32>} : memref<1x1x16x128xf32, #tpu.memory_space<vmem>>, vector<1x1x8x128xf32>,
      %c0_29 = arith.constant 0 : index
      %c0_30 = arith.constant 0 : index
      %c8_31 = arith.constant 8 : index
      %c0_32 = arith.constant 0 : index
      %67 = vector.load %arg4[%c0_29, %c0_30, %c8_31, %c0_32] : memref<1x1x16x128xf32, #tpu.memory_space<vmem>>, vector<1x1x8x128xf32>
      %68 = vector.shape_cast %67 : vector<1x1x8x128xf32> to vector<8x128xf32>
      %c16_i32_33 = arith.constant 16 : i32
      %69 = tpu.dynamic_rotate %68 by %c16_i32_33 dim 1 : vector<8x128xf32>, i32 -> vector<8x128xf32>
      %c112_i32_34 = arith.constant 112 : i32
      %70 = tpu.dynamic_rotate %68 by %c112_i32_34 dim 1 : vector<8x128xf32>, i32 -> vector<8x128xf32>
      %71 = arith.select %32, %69, %70 : vector<8x128xi1>, vector<8x128xf32>
      %c32_i32_35 = arith.constant 32 : i32
      %72 = tpu.dynamic_rotate %71 by %c32_i32_35 dim 1 : vector<8x128xf32>, i32 -> vector<8x128xf32>
      %c96_i32_36 = arith.constant 96 : i32
      %73 = tpu.dynamic_rotate %71 by %c96_i32_36 dim 1 : vector<8x128xf32>, i32 -> vector<8x128xf32>
      %74 = arith.select %37, %72, %73 : vector<8x128xi1>, vector<8x128xf32>
      %c64_i32_37 = arith.constant 64 : i32
      %75 = tpu.dynamic_rotate %74 by %c64_i32_37 dim 1 : vector<8x128xf32>, i32 -> vector<8x128xf32>
      %c1_i32_38 = arith.constant 1 : i32
      %76 = tpu.dynamic_rotate %75 by %c1_i32_38 dim 0 : vector<8x128xf32>, i32 -> vector<8x128xf32>
      %c7_i32_39 = arith.constant 7 : i32
      %77 = tpu.dynamic_rotate %75 by %c7_i32_39 dim 0 : vector<8x128xf32>, i32 -> vector<8x128xf32>
      %78 = arith.select %42, %76, %77 : vector<8x128xi1>, vector<8x128xf32>
      %c2_i32_40 = arith.constant 2 : i32
      %79 = tpu.dynamic_rotate %78 by %c2_i32_40 dim 0 : vector<8x128xf32>, i32 -> vector<8x128xf32>
      %c6_i32_41 = arith.constant 6 : i32
      %80 = tpu.dynamic_rotate %78 by %c6_i32_41 dim 0 : vector<8x128xf32>, i32 -> vector<8x128xf32>
      %81 = arith.select %47, %79, %80 : vector<8x128xi1>, vector<8x128xf32>
      %c4_i32_42 = arith.constant 4 : i32
      %82 = tpu.dynamic_rotate %81 by %c4_i32_42 dim 0 : vector<8x128xf32>, i32 -> vector<8x128xf32>
      %c0_43 = arith.constant 0 : index
      %c0_44 = arith.constant 0 : index
      %c0_45 = arith.constant 0 : index
      %c0_46 = arith.constant 0 : index
      %83 = vector.load %arg5[%c0_43, %c0_44, %c0_45, %c0_46] : memref<1x1x16x128xf32, #tpu.memory_space<vmem>>, vector<1x1x8x128xf32>
      %84 = vector.shape_cast %83 : vector<1x1x8x128xf32> to vector<8x128xf32>
      %85 = vector.shape_cast %82 : vector<8x128xf32> to vector<1x1x8x128xf32>
      tpu.vector_store %arg5[%c0_43, %c0_44, %c0_45, %c0_46], %85 {strides = array<i32>} : memref<1x1x16x128xf32, #tpu.memory_space<vmem>>, vector<1x1x8x128xf32>,
    } else {
    }
    %c7_i32 = arith.constant 7 : i32
    %25 = arith.cmpi eq, %3, %c7_i32 : i32
    %26 = arith.extui %25 : i1 to i32
    %c0_i32_9 = arith.constant 0 : i32
    %27 = arith.cmpi ne, %26, %c0_i32_9 : i32
    scf.if %27 {
      %28 = tpu.iota {dimensions = array<i32: 1>} : vector<8x128xi32>
      %c1_i32_10 = arith.constant 1 : i32
      %29 = vector.broadcast %c1_i32_10 : i32 to vector<8x128xi32>
      %30 = arith.andi %28, %29 : vector<8x128xi32>
      %c0_i32_11 = arith.constant 0 : i32
      %31 = vector.broadcast %c0_i32_11 : i32 to vector<8x128xi32>
      %32 = arith.cmpi ne, %30, %31 : vector<8x128xi32>
      %33 = tpu.iota {dimensions = array<i32: 1>} : vector<8x128xi32>
      %c2_i32_12 = arith.constant 2 : i32
      %34 = vector.broadcast %c2_i32_12 : i32 to vector<8x128xi32>
      %35 = arith.andi %33, %34 : vector<8x128xi32>
      %c0_i32_13 = arith.constant 0 : i32
      %36 = vector.broadcast %c0_i32_13 : i32 to vector<8x128xi32>
      %37 = arith.cmpi ne, %35, %36 : vector<8x128xi32>
      %38 = tpu.iota {dimensions = array<i32: 1>} : vector<8x128xi32>
      %c4_i32_14 = arith.constant 4 : i32
      %39 = vector.broadcast %c4_i32_14 : i32 to vector<8x128xi32>
      %40 = arith.andi %38, %39 : vector<8x128xi32>
      %c0_i32_15 = arith.constant 0 : i32
      %41 = vector.broadcast %c0_i32_15 : i32 to vector<8x128xi32>
      %42 = arith.cmpi ne, %40, %41 : vector<8x128xi32>
      %43 = tpu.iota {dimensions = array<i32: 1>} : vector<8x128xi32>
      %c8_i32 = arith.constant 8 : i32
      %44 = vector.broadcast %c8_i32 : i32 to vector<8x128xi32>
      %45 = arith.andi %43, %44 : vector<8x128xi32>
      %c0_i32_16 = arith.constant 0 : i32
      %46 = vector.broadcast %c0_i32_16 : i32 to vector<8x128xi32>
      %47 = arith.cmpi ne, %45, %46 : vector<8x128xi32>
      %48 = tpu.iota {dimensions = array<i32: 1>} : vector<8x128xi32>
      %c16_i32 = arith.constant 16 : i32
      %49 = vector.broadcast %c16_i32 : i32 to vector<8x128xi32>
      %50 = arith.andi %48, %49 : vector<8x128xi32>
      %c0_i32_17 = arith.constant 0 : i32
      %51 = vector.broadcast %c0_i32_17 : i32 to vector<8x128xi32>
      %52 = arith.cmpi ne, %50, %51 : vector<8x128xi32>
      %53 = tpu.iota {dimensions = array<i32: 1>} : vector<8x128xi32>
      %c32_i32 = arith.constant 32 : i32
      %54 = vector.broadcast %c32_i32 : i32 to vector<8x128xi32>
      %55 = arith.andi %53, %54 : vector<8x128xi32>
      %c0_i32_18 = arith.constant 0 : i32
      %56 = vector.broadcast %c0_i32_18 : i32 to vector<8x128xi32>
      %57 = arith.cmpi ne, %55, %56 : vector<8x128xi32>
      %58 = tpu.iota {dimensions = array<i32: 0>} : vector<8x128xi32>
      %c1_i32_19 = arith.constant 1 : i32
      %59 = vector.broadcast %c1_i32_19 : i32 to vector<8x128xi32>
      %60 = arith.andi %58, %59 : vector<8x128xi32>
      %c0_i32_20 = arith.constant 0 : i32
      %61 = vector.broadcast %c0_i32_20 : i32 to vector<8x128xi32>
      %62 = arith.cmpi ne, %60, %61 : vector<8x128xi32>
      %63 = tpu.iota {dimensions = array<i32: 0>} : vector<8x128xi32>
      %c2_i32_21 = arith.constant 2 : i32
      %64 = vector.broadcast %c2_i32_21 : i32 to vector<8x128xi32>
      %65 = arith.andi %63, %64 : vector<8x128xi32>
      %c0_i32_22 = arith.constant 0 : i32
      %66 = vector.broadcast %c0_i32_22 : i32 to vector<8x128xi32>
      %67 = arith.cmpi ne, %65, %66 : vector<8x128xi32>
      %c0 = arith.constant 0 : index
      %c0_23 = arith.constant 0 : index
      %c0_24 = arith.constant 0 : index
      %c0_25 = arith.constant 0 : index
      %68 = vector.load %arg4[%c0, %c0_23, %c0_24, %c0_25] : memref<1x1x16x128xf32, #tpu.memory_space<vmem>>, vector<1x1x8x128xf32>
      %69 = vector.shape_cast %68 : vector<1x1x8x128xf32> to vector<8x128xf32>
      %c1_i32_26 = arith.constant 1 : i32
      %70 = tpu.dynamic_rotate %69 by %c1_i32_26 dim 1 : vector<8x128xf32>, i32 -> vector<8x128xf32>
      %c127_i32 = arith.constant 127 : i32
      %71 = tpu.dynamic_rotate %69 by %c127_i32 dim 1 : vector<8x128xf32>, i32 -> vector<8x128xf32>
      %72 = arith.select %32, %70, %71 : vector<8x128xi1>, vector<8x128xf32>
      %c2_i32_27 = arith.constant 2 : i32
      %73 = tpu.dynamic_rotate %72 by %c2_i32_27 dim 1 : vector<8x128xf32>, i32 -> vector<8x128xf32>
      %c126_i32 = arith.constant 126 : i32
      %74 = tpu.dynamic_rotate %72 by %c126_i32 dim 1 : vector<8x128xf32>, i32 -> vector<8x128xf32>
      %75 = arith.select %37, %73, %74 : vector<8x128xi1>, vector<8x128xf32>
      %c4_i32_28 = arith.constant 4 : i32
      %76 = tpu.dynamic_rotate %75 by %c4_i32_28 dim 1 : vector<8x128xf32>, i32 -> vector<8x128xf32>
      %c124_i32 = arith.constant 124 : i32
      %77 = tpu.dynamic_rotate %75 by %c124_i32 dim 1 : vector<8x128xf32>, i32 -> vector<8x128xf32>
      %78 = arith.select %42, %76, %77 : vector<8x128xi1>, vector<8x128xf32>
      %c8_i32_29 = arith.constant 8 : i32
      %79 = tpu.dynamic_rotate %78 by %c8_i32_29 dim 1 : vector<8x128xf32>, i32 -> vector<8x128xf32>
      %c120_i32 = arith.constant 120 : i32
      %80 = tpu.dynamic_rotate %78 by %c120_i32 dim 1 : vector<8x128xf32>, i32 -> vector<8x128xf32>
      %81 = arith.select %47, %79, %80 : vector<8x128xi1>, vector<8x128xf32>
      %c16_i32_30 = arith.constant 16 : i32
      %82 = tpu.dynamic_rotate %81 by %c16_i32_30 dim 1 : vector<8x128xf32>, i32 -> vector<8x128xf32>
      %c112_i32 = arith.constant 112 : i32
      %83 = tpu.dynamic_rotate %81 by %c112_i32 dim 1 : vector<8x128xf32>, i32 -> vector<8x128xf32>
      %84 = arith.select %52, %82, %83 : vector<8x128xi1>, vector<8x128xf32>
      %c32_i32_31 = arith.constant 32 : i32
      %85 = tpu.dynamic_rotate %84 by %c32_i32_31 dim 1 : vector<8x128xf32>, i32 -> vector<8x128xf32>
      %c96_i32 = arith.constant 96 : i32
      %86 = tpu.dynamic_rotate %84 by %c96_i32 dim 1 : vector<8x128xf32>, i32 -> vector<8x128xf32>
      %87 = arith.select %57, %85, %86 : vector<8x128xi1>, vector<8x128xf32>
      %c64_i32 = arith.constant 64 : i32
      %88 = tpu.dynamic_rotate %87 by %c64_i32 dim 1 : vector<8x128xf32>, i32 -> vector<8x128xf32>
      %c1_i32_32 = arith.constant 1 : i32
      %89 = tpu.dynamic_rotate %88 by %c1_i32_32 dim 0 : vector<8x128xf32>, i32 -> vector<8x128xf32>
      %c7_i32_33 = arith.constant 7 : i32
      %90 = tpu.dynamic_rotate %88 by %c7_i32_33 dim 0 : vector<8x128xf32>, i32 -> vector<8x128xf32>
      %91 = arith.select %62, %89, %90 : vector<8x128xi1>, vector<8x128xf32>
      %c2_i32_34 = arith.constant 2 : i32
      %92 = tpu.dynamic_rotate %91 by %c2_i32_34 dim 0 : vector<8x128xf32>, i32 -> vector<8x128xf32>
      %c6_i32_35 = arith.constant 6 : i32
      %93 = tpu.dynamic_rotate %91 by %c6_i32_35 dim 0 : vector<8x128xf32>, i32 -> vector<8x128xf32>
      %94 = arith.select %67, %92, %93 : vector<8x128xi1>, vector<8x128xf32>
      %c4_i32_36 = arith.constant 4 : i32
      %95 = tpu.dynamic_rotate %94 by %c4_i32_36 dim 0 : vector<8x128xf32>, i32 -> vector<8x128xf32>
      %c0_37 = arith.constant 0 : index
      %c0_38 = arith.constant 0 : index
      %c8 = arith.constant 8 : index
      %c0_39 = arith.constant 0 : index
      %96 = vector.load %arg5[%c0_37, %c0_38, %c8, %c0_39] : memref<1x1x16x128xf32, #tpu.memory_space<vmem>>, vector<1x1x8x128xf32>
      %97 = vector.shape_cast %96 : vector<1x1x8x128xf32> to vector<8x128xf32>
      %98 = vector.shape_cast %95 : vector<8x128xf32> to vector<1x1x8x128xf32>
      tpu.vector_store %arg5[%c0_37, %c0_38, %c8, %c0_39], %98 {strides = array<i32>} : memref<1x1x16x128xf32, #tpu.memory_space<vmem>>, vector<1x1x8x128xf32>,
      %c0_40 = arith.constant 0 : index
      %c0_41 = arith.constant 0 : index
      %c8_42 = arith.constant 8 : index
      %c0_43 = arith.constant 0 : index
      %99 = vector.load %arg4[%c0_40, %c0_41, %c8_42, %c0_43] : memref<1x1x16x128xf32, #tpu.memory_space<vmem>>, vector<1x1x8x128xf32>
      %100 = vector.shape_cast %99 : vector<1x1x8x128xf32> to vector<8x128xf32>
      %c1_i32_44 = arith.constant 1 : i32
      %101 = tpu.dynamic_rotate %100 by %c1_i32_44 dim 1 : vector<8x128xf32>, i32 -> vector<8x128xf32>
      %c127_i32_45 = arith.constant 127 : i32
      %102 = tpu.dynamic_rotate %100 by %c127_i32_45 dim 1 : vector<8x128xf32>, i32 -> vector<8x128xf32>
      %103 = arith.select %32, %101, %102 : vector<8x128xi1>, vector<8x128xf32>
      %c2_i32_46 = arith.constant 2 : i32
      %104 = tpu.dynamic_rotate %103 by %c2_i32_46 dim 1 : vector<8x128xf32>, i32 -> vector<8x128xf32>
      %c126_i32_47 = arith.constant 126 : i32
      %105 = tpu.dynamic_rotate %103 by %c126_i32_47 dim 1 : vector<8x128xf32>, i32 -> vector<8x128xf32>
      %106 = arith.select %37, %104, %105 : vector<8x128xi1>, vector<8x128xf32>
      %c4_i32_48 = arith.constant 4 : i32
      %107 = tpu.dynamic_rotate %106 by %c4_i32_48 dim 1 : vector<8x128xf32>, i32 -> vector<8x128xf32>
      %c124_i32_49 = arith.constant 124 : i32
      %108 = tpu.dynamic_rotate %106 by %c124_i32_49 dim 1 : vector<8x128xf32>, i32 -> vector<8x128xf32>
      %109 = arith.select %42, %107, %108 : vector<8x128xi1>, vector<8x128xf32>
      %c8_i32_50 = arith.constant 8 : i32
      %110 = tpu.dynamic_rotate %109 by %c8_i32_50 dim 1 : vector<8x128xf32>, i32 -> vector<8x128xf32>
      %c120_i32_51 = arith.constant 120 : i32
      %111 = tpu.dynamic_rotate %109 by %c120_i32_51 dim 1 : vector<8x128xf32>, i32 -> vector<8x128xf32>
      %112 = arith.select %47, %110, %111 : vector<8x128xi1>, vector<8x128xf32>
      %c16_i32_52 = arith.constant 16 : i32
      %113 = tpu.dynamic_rotate %112 by %c16_i32_52 dim 1 : vector<8x128xf32>, i32 -> vector<8x128xf32>
      %c112_i32_53 = arith.constant 112 : i32
      %114 = tpu.dynamic_rotate %112 by %c112_i32_53 dim 1 : vector<8x128xf32>, i32 -> vector<8x128xf32>
      %115 = arith.select %52, %113, %114 : vector<8x128xi1>, vector<8x128xf32>
      %c32_i32_54 = arith.constant 32 : i32
      %116 = tpu.dynamic_rotate %115 by %c32_i32_54 dim 1 : vector<8x128xf32>, i32 -> vector<8x128xf32>
      %c96_i32_55 = arith.constant 96 : i32
      %117 = tpu.dynamic_rotate %115 by %c96_i32_55 dim 1 : vector<8x128xf32>, i32 -> vector<8x128xf32>
      %118 = arith.select %57, %116, %117 : vector<8x128xi1>, vector<8x128xf32>
      %c64_i32_56 = arith.constant 64 : i32
      %119 = tpu.dynamic_rotate %118 by %c64_i32_56 dim 1 : vector<8x128xf32>, i32 -> vector<8x128xf32>
      %c1_i32_57 = arith.constant 1 : i32
      %120 = tpu.dynamic_rotate %119 by %c1_i32_57 dim 0 : vector<8x128xf32>, i32 -> vector<8x128xf32>
      %c7_i32_58 = arith.constant 7 : i32
      %121 = tpu.dynamic_rotate %119 by %c7_i32_58 dim 0 : vector<8x128xf32>, i32 -> vector<8x128xf32>
      %122 = arith.select %62, %120, %121 : vector<8x128xi1>, vector<8x128xf32>
      %c2_i32_59 = arith.constant 2 : i32
      %123 = tpu.dynamic_rotate %122 by %c2_i32_59 dim 0 : vector<8x128xf32>, i32 -> vector<8x128xf32>
      %c6_i32_60 = arith.constant 6 : i32
      %124 = tpu.dynamic_rotate %122 by %c6_i32_60 dim 0 : vector<8x128xf32>, i32 -> vector<8x128xf32>
      %125 = arith.select %67, %123, %124 : vector<8x128xi1>, vector<8x128xf32>
      %c4_i32_61 = arith.constant 4 : i32
      %126 = tpu.dynamic_rotate %125 by %c4_i32_61 dim 0 : vector<8x128xf32>, i32 -> vector<8x128xf32>
      %c0_62 = arith.constant 0 : index
      %c0_63 = arith.constant 0 : index
      %c0_64 = arith.constant 0 : index
      %c0_65 = arith.constant 0 : index
      %127 = vector.load %arg5[%c0_62, %c0_63, %c0_64, %c0_65] : memref<1x1x16x128xf32, #tpu.memory_space<vmem>>, vector<1x1x8x128xf32>
      %128 = vector.shape_cast %127 : vector<1x1x8x128xf32> to vector<8x128xf32>
      %129 = vector.shape_cast %126 : vector<8x128xf32> to vector<1x1x8x128xf32>
      tpu.vector_store %arg5[%c0_62, %c0_63, %c0_64, %c0_65], %129 {strides = array<i32>} : memref<1x1x16x128xf32, #tpu.memory_space<vmem>>, vector<1x1x8x128xf32>,
    } else {
    }
    return
  }
  func.func @transform_0(%arg0: i32, %arg1: i32, %arg2: i32, %arg3: memref<4xi32, #tpu.memory_space<smem>>) -> (i32, i32, i32, i32) {
    %c2_i32 = arith.constant 2 : i32
    %0 = arith.muli %c2_i32, %arg1 : i32
    %1 = arith.index_cast %0 : i32 to index
    %2 = memref.load %arg3[%1] : memref<4xi32, #tpu.memory_space<smem>>
    %3 = arith.xori %arg2, %2 : i32
    %c0_i32 = arith.constant 0 : i32
    %c0_i32_0 = arith.constant 0 : i32
    return %arg1, %arg0, %3, %c0_i32 : i32, i32, i32, i32
  }
  func.func @transform_1(%arg0: i32, %arg1: i32, %arg2: i32, %arg3: memref<4xi32, #tpu.memory_space<smem>>) -> (i32, i32, i32, i32) {
    %c0_i32 = arith.constant 0 : i32
    %c0_i32_0 = arith.constant 0 : i32
    return %arg1, %arg0, %arg2, %c0_i32 : i32, i32, i32, i32
  }
}

</mosaic_0001>

<bundles_post_ra>
// kernel: random_volume_flip_batch.1
= control target key start
LH: loop header
LB: loop body
LE: loop exit
PB: predicated region body
PF: predicated region fallthrough
CT: control target
= control target key end

     0   :  { %s1158_s0 = inlined_call_operand.vmem [shape: s32[4], index: 0, kind: input, shape index: {}]   ;;  %s1159_s1 = inlined_call_operand.vmem [shape: f32[2,4,16,128], index: 1, kind: input, shape index: {}]   ;;  %s1160_s2 = inlined_call_operand.vmem [shape: f32[2,4,16,128], index: 2, kind: output, shape index: {}]  }
   0x1   :  { %s7_s11 = sshll.u32 %s1158_s0, 4  ;;  %s8_s11 = int_to_ptr.vmem [resolvable:$true] %s7_s11 }
   0x2   :  { %s916_s12 = scalar_lea.vmem %s8_s11, 16  ;;  %p921_p1 = scmp.lt.s32.totalorder %s8_s11, %s8_s11 }
   0x3   :  { %p917_p0 = scmp.ne.s32.totalorder %s8_s11, %s916_s12  ;;  %p922_p2 = scmp.lt.s32.totalorder %s916_s12, %s916_s12 }
   0x5   :  { %p923_p3 = por %p922_p2, %p921_p1 }
   0x7   :  { %p924_p4 = pnand %p923_p3, %p917_p0 }
   0x9   :  { %927 = shalt.err (!%p924_p4)  }
   0xa   :  { %s970_s13 = smov [#allocation3]  }
   0xb   :  { %10 = dma.vmem_to_smem %s8_s11, 16, %s970_s13, [#allocation2] }
   0xc   :  { %948 = dma.done.wait [#allocation2], 16 }
   0xd   :  { %949 = vsyncadd [#allocation2], 4294967280 }
   0xe   :  { %12 = sfence }
   0xf   :  { %s1041_s14 = smov 0   ;;  %s1043_s15 = smov 0  }
  0x10   :  { %s1045_s16 = smov 0   ;;  %s1047_s0 = smov 0  }
  0x11   :  { %s1049_s17 = smov 0  }
  0x12 LB: > { %s33_s18 = sadd.s32 1, %s960_s16  ;;  %s37_s19 = sadd.s32 1, %s964_s0  ;;  %s968_s17 = sphi %s1049_s17, %s18_s17   ;;  %s964_s0 = sphi %s1047_s0, %s1164_s0   ;;  %s960_s16 = sphi %s1045_s16, %s1163_s16   ;;  %s956_s15 = sphi %s1043_s15, %s1162_s15   ;;  %s952_s14 = sphi %s1041_s14, %s1161_s14  }
  0x13   : > { %p35_p5 = scmp.ge.s32.totalorder %s33_s18, 2  ;;  %p803_p6 = scmp.ge.s32.totalorder %s968_s17, 1 }
  0x14   : > { %p142_p7 = scmp.lt.s32.totalorder %s968_s17, 9 }
  0x15   : > { %s1166_s18 = smov (%p35_p5, %s33_s18), 0  ;;  %s1168_s19 = smov (!%p35_p5, %s37_s19), %s964_s0 }
  0x16   : > { %p143_p8 = pnand %p803_p6, %p142_p7  ;;  %p39_p9 = scmp.ge.s32.totalorder %s1168_s19, 4 }
  0x17   : > { %s804_s20 = sshll.u32 (!%p143_p8), %s952_s14, 1  ;;  %p185_p10 = scmp.lt.s32.totalorder (!%p143_p8), %s952_s14, 1 }
  0x18   : > { %s1170_s19 = smov (%p39_p9, %s1168_s19), 0  ;;  %146 = sbr.rel (%p143_p8) target bundleno = 3393 (0xd41), region = 24 }
  0x19   : > { %s182_s21 = sld [smem:[#allocation3 + %s804_s20]] (!%p143_p8)  ;;  %p187_p11 = scmp.lt.s32.totalorder (!%p143_p8), %s956_s15, 3 }
  0x1a   : > { %s216_s23 = sadd.s32 (!%p143_p8), 1, %s804_s20 }
  0x1b   : > { %s1071_s25 = sld [smem:[#allocation3 + %s216_s23]] (!%p143_p8) }
  0x1f   : > { %s1172_s14 = smov (!%p185_p10, %s952_s14), 1  ;;  %s1174_s15 = smov (!%p187_p11, %s956_s15), 3 }
  0x20   : > { %s807_s22 = sshll.u32 %s1172_s14, 3  ;;  %s806_s24 = sshll.u32 %s1174_s15, 1 }
  0x21   : > { %s211_s26 = sadd.s32 %s807_s22, %s806_s24  ;;  %s805_s27 = sshll.u32 %s182_s21, 1 }
  0x22   : > { %s811_s28 = sshll.u32 %s211_s26, 3  ;;  %p189_p12 = scmp.lt.s32.totalorder %s805_s27, 1 }
  0x23   : > { %s1076_s3 = scalar_lea.vmem %s1160_s2, %s811_s28  ;;  %p813_p13 = scmp.ne.s32.totalorder %s1071_s25, 0 }
  0x24   : > { %s1176_s27 = smov (!%p189_p12, %s805_s27), 1 }
  0x25   : > { %s192_s4 = sadd.s32 %s806_s24, %s1176_s27  ;;  %221 = sbr.rel (%p813_p13) target bundleno = 44 (0x2c), region = 28 }
  0x26   : > { %s194_s5 = sadd.s32 %s807_s22, %s192_s4 }
  0x27   : > { %s808_s6 = sshll.u32 %s194_s5, 3 }
  0x28   : > { %s1081_s9 = scalar_lea.vmem %s1159_s1, %s808_s6 }
  0x29   : > { %v222_v0 = vld [vmem:[%s1081_s9] sm:$0xff] (!%p813_p13)  ;;  %v223_v1 = vld [vmem:[%s1081_s9 + $0x8] sm:$0xff] (!%p813_p13) }
  0x2a   : > { %224 = vst [vmem:[%s1076_s3] sm:$0xff] (!%p813_p13), %v222_v0  ;;  %225 = vst [vmem:[%s1076_s3 + $0x8] sm:$0xff] (!%p813_p13), %v223_v1 }
  0x2c PF: > { %p814_p0 = scmp.ne.s32.totalorder %s1071_s25, 1 }
  0x2d   : > { %v262_v2 = vld [vmem:[%s1081_s9 + $0x8] sm:$0xff] (!%p814_p0)  ;;  %v240_v3 = vld [vmem:[%s1081_s9] sm:$0xff] (!%p814_p0)  ;;  %s971_s10 = smov (!%p814_p0), 1   ;;  %s972_s11 = smov (!%p814_p0), 127   ;;  %v230_v4 = vlaneseq (!%p814_p0) }
  0x2e   : > { %229 = sbr.rel (%p814_p0) target bundleno = 519 (0x207), region = 32  ;;  %263 = vrot.lane.b32.xlu1 (!%p814_p0), %v262_v2, %s971_s10  ;;  %241 = vrot.lane.b32.xlu0 (!%p814_p0), %v240_v3, %s971_s10  ;;  %s973_s12 = smov (!%p814_p0), 126  }
  0x2f   : > { %v231_v5 = vand.u32 (!%p814_p0), 127, %v230_v4  ;;  %s974_s13 = smov (!%p814_p0), 2   ;;  %s975_s14 = smov (!%p814_p0), 124  }
  0x30   : > { %s976_s15 = smov (!%p814_p0), 4   ;;  %s977_s20 = smov (!%p814_p0), 120  }
  0x31   : > { %v232_v6 = vand.u32 (!%p814_p0), 1, %v231_v5  ;;  %v234_v13 = vand.u32 (!%p814_p0), 2, %v231_v5  ;;  %v236_v20 = vand.u32 (!%p814_p0), 4, %v231_v5  ;;  %s978_s21 = smov (!%p814_p0), 8   ;;  %v238_v27 = vand.u32 (!%p814_p0), 8, %v231_v5 }
  0x32   : > { %265 = vrot.lane.b32.xlu1 (!%p814_p0), %v262_v2, %s972_s11  ;;  %243 = vrot.lane.b32.xlu0 (!%p814_p0), %v240_v3, %s972_s11 }
  0x33   : > { %vm233_vm0 = vcmp.ne.s32.totalorder (!%p814_p0), %v232_v6, 0  ;;  %vm235_vm1 = vcmp.ne.s32.totalorder (!%p814_p0), %v234_v13, 0  ;;  %vm237_vm2 = vcmp.ne.s32.totalorder (!%p814_p0), %v236_v20, 0  ;;  %vm239_vm3 = vcmp.ne.s32.totalorder (!%p814_p0), %v238_v27, 0 }
  0xa0   : > { %v264_v7 = vpop.permute.xlu1 %263  ;;  %v242_v8 = vpop.permute.xlu0 %241 }
  0xa4   : > { %v244_v9 = vpop.permute.xlu0 %243  ;;  %v266_v11 = vpop.permute.xlu1 %265 }
  0xa5   : > { %v245_v10 = vsel %vm233_vm0, %v242_v8, %v244_v9  ;;  %v267_v12 = vsel %vm233_vm0, %v264_v7, %v266_v11 }
  0xa6   : > { %248 = vrot.lane.b32.xlu1 %v245_v10, %s973_s12  ;;  %246 = vrot.lane.b32.xlu0 %v245_v10, %s974_s13 }
  0xaa   : > { %270 = vrot.lane.b32.xlu1 %v267_v12, %s973_s12  ;;  %268 = vrot.lane.b32.xlu0 %v267_v12, %s974_s13 }
 0x118   : > { %v249_v14 = vpop.permute.xlu1 %248  ;;  %v247_v15 = vpop.permute.xlu0 %246 }
 0x119   : > { %v250_v16 = vsel %vm235_vm1, %v247_v15, %v249_v14 }
 0x11a   : > { %253 = vrot.lane.b32.xlu1 %v250_v16, %s975_s14  ;;  %251 = vrot.lane.b32.xlu0 %v250_v16, %s976_s15 }
 0x11c   : > { %v271_v17 = vpop.permute.xlu1 %270  ;;  %v269_v18 = vpop.permute.xlu0 %268 }
 0x11d   : > { %v272_v19 = vsel %vm235_vm1, %v269_v18, %v271_v17 }
 0x11e   : > { %275 = vrot.lane.b32.xlu1 %v272_v19, %s975_s14  ;;  %273 = vrot.lane.b32.xlu0 %v272_v19, %s976_s15 }
 0x18c   : > { %v254_v21 = vpop.permute.xlu1 %253  ;;  %v252_v22 = vpop.permute.xlu0 %251 }
 0x18d   : > { %v255_v23 = vsel %vm237_vm2, %v252_v22, %v254_v21 }
 0x18e   : > { %258 = vrot.lane.b32.xlu1 %v255_v23, %s977_s20  ;;  %256 = vrot.lane.b32.xlu0 %v255_v23, %s978_s21 }
 0x190   : > { %v276_v24 = vpop.permute.xlu1 %275  ;;  %v274_v25 = vpop.permute.xlu0 %273 }
 0x191   : > { %v277_v26 = vsel %vm237_vm2, %v274_v25, %v276_v24 }
 0x192   : > { %280 = vrot.lane.b32.xlu1 %v277_v26, %s977_s20  ;;  %278 = vrot.lane.b32.xlu0 %v277_v26, %s978_s21 }
 0x200   : > { %v259_v28 = vpop.permute.xlu1 %258  ;;  %v257_v29 = vpop.permute.xlu0 %256 }
 0x201   : > { %v260_v30 = vsel %vm239_vm3, %v257_v29, %v259_v28 }
 0x202   : > { %261 = vst [vmem:[%s1076_s3] sm:$0xff] %v260_v30 }
 0x204   : > { %v281_v31 = vpop.permute.xlu1 %280  ;;  %v279_v32 = vpop.permute.xlu0 %278 }
 0x205   : > { %v282_v33 = vsel %vm239_vm3, %v279_v32, %v281_v31 }
 0x206   : > { %283 = vst [vmem:[%s1076_s3 + $0x8] sm:$0xff] %v282_v33 }
 0x207 PF: > { %p815_p1 = scmp.ne.s32.totalorder %s1071_s25, 2 }
 0x208   : > { %v315_v34 = vld [vmem:[%s1081_s9 + $0x8] sm:$0xff] (!%p815_p1)  ;;  %v298_v35 = vld [vmem:[%s1081_s9] sm:$0xff] (!%p815_p1)  ;;  %s979_s22 = smov (!%p815_p1), 16   ;;  %s980_s23 = smov (!%p815_p1), 112   ;;  %v288_v36 = vlaneseq (!%p815_p1) }
 0x209   : > { %287 = sbr.rel (%p815_p1) target bundleno = 880 (0x370), region = 36  ;;  %316 = vrot.lane.b32.xlu1 (!%p815_p1), %v315_v34, %s979_s22  ;;  %299 = vrot.lane.b32.xlu0 (!%p815_p1), %v298_v35, %s979_s22  ;;  %s981_s24 = smov (!%p815_p1), 96  }
 0x20a   : > { %v289_v37 = vand.u32 (!%p815_p1), 127, %v288_v36  ;;  %s982_s26 = smov (!%p815_p1), 32   ;;  %s983_s27 = smov (!%p815_p1), 64   ;;  %v295_v52 = vshrl.u32 (!%p815_p1), %v288_v36, 7 }
 0x20c   : > { %v290_v38 = vand.u32 (!%p815_p1), 16, %v289_v37  ;;  %v292_v45 = vand.u32 (!%p815_p1), 32, %v289_v37  ;;  %v296_v53 = vand.u32 (!%p815_p1), 1, %v295_v52 }
 0x20d   : > { %318 = vrot.lane.b32.xlu1 (!%p815_p1), %v315_v34, %s980_s23  ;;  %301 = vrot.lane.b32.xlu0 (!%p815_p1), %v298_v35, %s980_s23 }
 0x20e   : > { %vm291_vm4 = vcmp.ne.s32.totalorder (!%p815_p1), %v290_v38, 0  ;;  %vm293_vm5 = vcmp.ne.s32.totalorder (!%p815_p1), %v292_v45, 0  ;;  %vm297_vm6 = vcmp.ne.s32.totalorder (!%p815_p1), %v296_v53, 0 }
 0x27b   : > { %v317_v39 = vpop.permute.xlu1 %316  ;;  %v300_v40 = vpop.permute.xlu0 %299 }
 0x27f   : > { %v302_v41 = vpop.permute.xlu0 %301  ;;  %v319_v43 = vpop.permute.xlu1 %318 }
 0x280   : > { %v303_v42 = vsel %vm291_vm4, %v300_v40, %v302_v41  ;;  %v320_v44 = vsel %vm291_vm4, %v317_v39, %v319_v43 }
 0x281   : > { %306 = vrot.lane.b32.xlu1 %v303_v42, %s981_s24  ;;  %304 = vrot.lane.b32.xlu0 %v303_v42, %s982_s26 }
 0x285   : > { %323 = vrot.lane.b32.xlu1 %v320_v44, %s981_s24  ;;  %321 = vrot.lane.b32.xlu0 %v320_v44, %s982_s26 }
 0x2f3   : > { %v307_v46 = vpop.permute.xlu1 %306  ;;  %v305_v47 = vpop.permute.xlu0 %304 }
 0x2f4   : > { %v308_v48 = vsel %vm293_vm5, %v305_v47, %v307_v46 }
 0x2f5   : > { %309 = vrot.lane.b32.xlu0 %v308_v48, %s983_s27 }
 0x2f7   : > { %v324_v49 = vpop.permute.xlu1 %323  ;;  %v322_v50 = vpop.permute.xlu0 %321 }
 0x2f8   : > { %v325_v51 = vsel %vm293_vm5, %v322_v50, %v324_v49 }
 0x2f9   : > { %326 = vrot.lane.b32.xlu1 %v325_v51, %s983_s27 }
 0x367   : > { %v310_v54 = vpop.permute.xlu0 %309 }
 0x368   : > { %v311_v55 = vrot.slane %v310_v54, 7  ;;  %v312_v56 = vrot.slane %v310_v54, 1 }
 0x36a   : > { %v313_v57 = vsel %vm297_vm6, %v311_v55, %v312_v56 }
 0x36b   : > { %314 = vst [vmem:[%s1076_s3] sm:$0xff] %v313_v57  ;;  %v327_v58 = vpop.permute.xlu1 %326 }
 0x36c   : > { %v328_v59 = vrot.slane %v327_v58, 7  ;;  %v329_v60 = vrot.slane %v327_v58, 1 }
 0x36e   : > { %v330_v61 = vsel %vm297_vm6, %v328_v59, %v329_v60 }
 0x36f   : > { %331 = vst [vmem:[%s1076_s3 + $0x8] sm:$0xff] %v330_v61 }
 0x370 PF: > { %p816_p2 = scmp.ne.s32.totalorder %s1071_s25, 3 }
 0x371   : > { %v391_v62 = vld [vmem:[%s1081_s9 + $0x8] sm:$0xff] (!%p816_p2)  ;;  %v354_v63 = vld [vmem:[%s1081_s9] sm:$0xff] (!%p816_p2)  ;;  %s984_s28 = smov (!%p816_p2), 1   ;;  %s985_s29 = smov (!%p816_p2), 127   ;;  %v336_v0 = vlaneseq (!%p816_p2) }
 0x372   : > { %335 = sbr.rel (%p816_p2) target bundleno = 1705 (0x6a9), region = 40  ;;  %392 = vrot.lane.b32.xlu1 (!%p816_p2), %v391_v62, %s984_s28  ;;  %355 = vrot.lane.b32.xlu0 (!%p816_p2), %v354_v63, %s984_s28  ;;  %s986_s30 = smov (!%p816_p2), 126  }
 0x373   : > { %v1102_v1 = vand.u32 (!%p816_p2), 127, %v336_v0  ;;  %s987_s4 = smov (!%p816_p2), 2   ;;  %s988_s5 = smov (!%p816_p2), 124   ;;  %v351_v44 = vshrl.u32 (!%p816_p2), %v336_v0, 7 }
 0x374   : > { %s989_s6 = smov (!%p816_p2), 4   ;;  %s990_s7 = smov (!%p816_p2), 120  }
 0x375   : > { %v338_v2 = vand.u32 (!%p816_p2), 1, %v1102_v1  ;;  %v340_v9 = vand.u32 (!%p816_p2), 2, %v1102_v1  ;;  %v342_v16 = vand.u32 (!%p816_p2), 4, %v1102_v1  ;;  %s991_s8 = smov (!%p816_p2), 8   ;;  %v344_v23 = vand.u32 (!%p816_p2), 8, %v1102_v1  ;;  %s992_s10 = smov (!%p816_p2), 112  }
 0x376   : > { %394 = vrot.lane.b32.xlu1 (!%p816_p2), %v391_v62, %s985_s29  ;;  %357 = vrot.lane.b32.xlu0 (!%p816_p2), %v354_v63, %s985_s29  ;;  %s993_s11 = smov (!%p816_p2), 16   ;;  %v346_v30 = vand.u32 (!%p816_p2), 16, %v1102_v1  ;;  %s994_s12 = smov (!%p816_p2), 96   ;;  %v348_v37 = vand.u32 (!%p816_p2), 32, %v1102_v1  ;;  %v352_v45 = vand.u32 (!%p816_p2), 1, %v351_v44 }
 0x377   : > { %vm339_vm7 = vcmp.ne.s32.totalorder (!%p816_p2), %v338_v2, 0  ;;  %vm341_vm8 = vcmp.ne.s32.totalorder (!%p816_p2), %v340_v9, 0  ;;  %vm343_vm9 = vcmp.ne.s32.totalorder (!%p816_p2), %v342_v16, 0  ;;  %vm345_vm10 = vcmp.ne.s32.totalorder (!%p816_p2), %v344_v23, 0  ;;  %s995_s13 = smov (!%p816_p2), 32   ;;  %s996_s14 = smov (!%p816_p2), 64  }
 0x378   : > { %vm347_vm11 = vcmp.ne.s32.totalorder (!%p816_p2), %v346_v30, 0  ;;  %vm349_vm12 = vcmp.ne.s32.totalorder (!%p816_p2), %v348_v37, 0  ;;  %vm353_vm13 = vcmp.ne.s32.totalorder (!%p816_p2), %v352_v45, 0 }
 0x3e4   : > { %v393_v3 = vpop.permute.xlu1 %392  ;;  %v356_v4 = vpop.permute.xlu0 %355 }
 0x3e8   : > { %v358_v5 = vpop.permute.xlu0 %357  ;;  %v395_v7 = vpop.permute.xlu1 %394 }
 0x3e9   : > { %v359_v6 = vsel %vm339_vm7, %v356_v4, %v358_v5  ;;  %v396_v8 = vsel %vm339_vm7, %v393_v3, %v395_v7 }
 0x3ea   : > { %362 = vrot.lane.b32.xlu1 %v359_v6, %s986_s30  ;;  %360 = vrot.lane.b32.xlu0 %v359_v6, %s987_s4 }
 0x3ee   : > { %399 = vrot.lane.b32.xlu1 %v396_v8, %s986_s30  ;;  %397 = vrot.lane.b32.xlu0 %v396_v8, %s987_s4 }
 0x45c   : > { %v363_v10 = vpop.permute.xlu1 %362  ;;  %v361_v11 = vpop.permute.xlu0 %360 }
 0x45d   : > { %v364_v12 = vsel %vm341_vm8, %v361_v11, %v363_v10 }
 0x45e   : > { %367 = vrot.lane.b32.xlu1 %v364_v12, %s988_s5  ;;  %365 = vrot.lane.b32.xlu0 %v364_v12, %s989_s6 }
 0x460   : > { %v400_v13 = vpop.permute.xlu1 %399  ;;  %v398_v14 = vpop.permute.xlu0 %397 }
 0x461   : > { %v401_v15 = vsel %vm341_vm8, %v398_v14, %v400_v13 }
 0x462   : > { %404 = vrot.lane.b32.xlu1 %v401_v15, %s988_s5  ;;  %402 = vrot.lane.b32.xlu0 %v401_v15, %s989_s6 }
 0x4d0   : > { %v368_v17 = vpop.permute.xlu1 %367  ;;  %v366_v18 = vpop.permute.xlu0 %365 }
 0x4d1   : > { %v369_v19 = vsel %vm343_vm9, %v366_v18, %v368_v17 }
 0x4d2   : > { %372 = vrot.lane.b32.xlu1 %v369_v19, %s990_s7  ;;  %370 = vrot.lane.b32.xlu0 %v369_v19, %s991_s8 }
 0x4d4   : > { %v405_v20 = vpop.permute.xlu1 %404  ;;  %v403_v21 = vpop.permute.xlu0 %402 }
 0x4d5   : > { %v406_v22 = vsel %vm343_vm9, %v403_v21, %v405_v20 }
 0x4d6   : > { %409 = vrot.lane.b32.xlu1 %v406_v22, %s990_s7  ;;  %407 = vrot.lane.b32.xlu0 %v406_v22, %s991_s8 }
 0x544   : > { %v373_v24 = vpop.permute.xlu1 %372  ;;  %v371_v25 = vpop.permute.xlu0 %370 }
 0x545   : > { %v374_v26 = vsel %vm345_vm10, %v371_v25, %v373_v24 }
 0x546   : > { %377 = vrot.lane.b32.xlu1 %v374_v26, %s992_s10  ;;  %375 = vrot.lane.b32.xlu0 %v374_v26, %s993_s11 }
 0x548   : > { %v410_v27 = vpop.permute.xlu1 %409  ;;  %v408_v28 = vpop.permute.xlu0 %407 }
 0x549   : > { %v411_v29 = vsel %vm345_vm10, %v408_v28, %v410_v27 }
 0x54a   : > { %414 = vrot.lane.b32.xlu1 %v411_v29, %s992_s10  ;;  %412 = vrot.lane.b32.xlu0 %v411_v29, %s993_s11 }
 0x5b8   : > { %v378_v31 = vpop.permute.xlu1 %377  ;;  %v376_v32 = vpop.permute.xlu0 %375 }
 0x5b9   : > { %v379_v33 = vsel %vm347_vm11, %v376_v32, %v378_v31 }
 0x5ba   : > { %382 = vrot.lane.b32.xlu1 %v379_v33, %s994_s12  ;;  %380 = vrot.lane.b32.xlu0 %v379_v33, %s995_s13 }
 0x5bc   : > { %v415_v34 = vpop.permute.xlu1 %414  ;;  %v413_v35 = vpop.permute.xlu0 %412 }
 0x5bd   : > { %v416_v36 = vsel %vm347_vm11, %v413_v35, %v415_v34 }
 0x5be   : > { %419 = vrot.lane.b32.xlu1 %v416_v36, %s994_s12  ;;  %417 = vrot.lane.b32.xlu0 %v416_v36, %s995_s13 }
 0x62c   : > { %v383_v38 = vpop.permute.xlu1 %382  ;;  %v381_v39 = vpop.permute.xlu0 %380 }
 0x62d   : > { %v384_v40 = vsel %vm349_vm12, %v381_v39, %v383_v38 }
 0x62e   : > { %385 = vrot.lane.b32.xlu0 %v384_v40, %s996_s14 }
 0x630   : > { %v420_v41 = vpop.permute.xlu1 %419  ;;  %v418_v42 = vpop.permute.xlu0 %417 }
 0x631   : > { %v421_v43 = vsel %vm349_vm12, %v418_v42, %v420_v41 }
 0x632   : > { %422 = vrot.lane.b32.xlu1 %v421_v43, %s996_s14 }
 0x6a0   : > { %v386_v46 = vpop.permute.xlu0 %385 }
 0x6a1   : > { %v387_v47 = vrot.slane %v386_v46, 7  ;;  %v388_v48 = vrot.slane %v386_v46, 1 }
 0x6a3   : > { %v389_v49 = vsel %vm353_vm13, %v387_v47, %v388_v48 }
 0x6a4   : > { %390 = vst [vmem:[%s1076_s3] sm:$0xff] %v389_v49  ;;  %v423_v50 = vpop.permute.xlu1 %422 }
 0x6a5   : > { %v424_v51 = vrot.slane %v423_v50, 7  ;;  %v425_v52 = vrot.slane %v423_v50, 1 }
 0x6a7   : > { %v426_v53 = vsel %vm353_vm13, %v424_v51, %v425_v52 }
 0x6a8   : > { %427 = vst [vmem:[%s1076_s3 + $0x8] sm:$0xff] %v426_v53 }
 0x6a9 PF: > { %p817_p3 = scmp.ne.s32.totalorder %s1071_s25, 4 }
 0x6aa   : > { %v432_v54 = vlaneseq (!%p817_p3)  ;;  %v436_v55 = vld [vmem:[%s1081_s9] sm:$0xff] (!%p817_p3)  ;;  %v442_v56 = vld [vmem:[%s1081_s9 + $0x8] sm:$0xff] (!%p817_p3) }
 0x6ab   : > { %431 = sbr.rel (%p817_p3) target bundleno = 1717 (0x6b5), region = 44  ;;  %v437_v58 = vrot.slane (!%p817_p3), %v436_v55, 6  ;;  %v438_v59 = vrot.slane (!%p817_p3), %v436_v55, 2  ;;  %v443_v60 = vrot.slane (!%p817_p3), %v442_v56, 6  ;;  %v444_v61 = vrot.slane (!%p817_p3), %v442_v56, 2 }
 0x6ac   : > { %v433_v57 = vshrl.u32 (!%p817_p3), %v432_v54, 7 }
 0x6ae   : > { %v434_v62 = vand.u32 (!%p817_p3), 2, %v433_v57 }
 0x6b0   : > { %vm435_vm14 = vcmp.ne.s32.totalorder (!%p817_p3), %v434_v62, 0 }
 0x6b1   : > { %v439_v63 = vsel (!%p817_p3), %vm435_vm14, %v437_v58, %v438_v59  ;;  %v445_v0 = vsel (!%p817_p3), %vm435_vm14, %v443_v60, %v444_v61 }
 0x6b2   : > { %v440_v1 = vrot.slane %v439_v63, 4  ;;  %v446_v2 = vrot.slane %v445_v0, 4 }
 0x6b4   : > { %441 = vst [vmem:[%s1076_s3 + $0x8] sm:$0xff] %v440_v1  ;;  %447 = vst [vmem:[%s1076_s3] sm:$0xff] %v446_v2 }
 0x6b5 PF: > { %p818_p4 = scmp.ne.s32.totalorder %s1071_s25, 5 }
 0x6b6   : > { %v492_v3 = vld [vmem:[%s1081_s9 + $0x8] sm:$0xff] (!%p818_p4)  ;;  %v466_v4 = vld [vmem:[%s1081_s9] sm:$0xff] (!%p818_p4)  ;;  %s997_s15 = smov (!%p818_p4), 1   ;;  %s998_s20 = smov (!%p818_p4), 127   ;;  %v452_v5 = vlaneseq (!%p818_p4) }
 0x6b7   : > { %451 = sbr.rel (%p818_p4) target bundleno = 2197 (0x895), region = 48  ;;  %493 = vrot.lane.b32.xlu1 (!%p818_p4), %v492_v3, %s997_s15  ;;  %467 = vrot.lane.b32.xlu0 (!%p818_p4), %v466_v4, %s997_s15  ;;  %s999_s21 = smov (!%p818_p4), 126  }
 0x6b8   : > { %v453_v6 = vand.u32 (!%p818_p4), 127, %v452_v5  ;;  %s1000_s22 = smov (!%p818_p4), 2   ;;  %s1001_s23 = smov (!%p818_p4), 124   ;;  %v463_v28 = vshrl.u32 (!%p818_p4), %v452_v5, 7 }
 0x6b9   : > { %s1002_s24 = smov (!%p818_p4), 4   ;;  %s1003_s26 = smov (!%p818_p4), 120  }
 0x6ba   : > { %v454_v7 = vand.u32 (!%p818_p4), 1, %v453_v6  ;;  %v456_v14 = vand.u32 (!%p818_p4), 2, %v453_v6  ;;  %v458_v21 = vand.u32 (!%p818_p4), 4, %v453_v6  ;;  %s1004_s27 = smov (!%p818_p4), 8   ;;  %v460_v29 = vand.u32 (!%p818_p4), 8, %v453_v6 }
 0x6bb   : > { %495 = vrot.lane.b32.xlu1 (!%p818_p4), %v492_v3, %s998_s20  ;;  %469 = vrot.lane.b32.xlu0 (!%p818_p4), %v466_v4, %s998_s20  ;;  %v464_v30 = vand.u32 (!%p818_p4), 2, %v463_v28 }
 0x6bc   : > { %vm455_vm15 = vcmp.ne.s32.totalorder (!%p818_p4), %v454_v7, 0  ;;  %vm457_vm0 = vcmp.ne.s32.totalorder (!%p818_p4), %v456_v14, 0  ;;  %vm459_vm1 = vcmp.ne.s32.totalorder (!%p818_p4), %v458_v21, 0  ;;  %vm461_vm2 = vcmp.ne.s32.totalorder (!%p818_p4), %v460_v29, 0 }
 0x6bd   : > { %vm465_vm3 = vcmp.ne.s32.totalorder (!%p818_p4), %v464_v30, 0 }
 0x729   : > { %v494_v8 = vpop.permute.xlu1 %493  ;;  %v468_v9 = vpop.permute.xlu0 %467 }
 0x72d   : > { %v470_v10 = vpop.permute.xlu0 %469  ;;  %v496_v12 = vpop.permute.xlu1 %495 }
 0x72e   : > { %v471_v11 = vsel %vm455_vm15, %v468_v9, %v470_v10  ;;  %v497_v13 = vsel %vm455_vm15, %v494_v8, %v496_v12 }
 0x72f   : > { %474 = vrot.lane.b32.xlu1 %v471_v11, %s999_s21  ;;  %472 = vrot.lane.b32.xlu0 %v471_v11, %s1000_s22 }
 0x733   : > { %500 = vrot.lane.b32.xlu1 %v497_v13, %s999_s21  ;;  %498 = vrot.lane.b32.xlu0 %v497_v13, %s1000_s22 }
 0x7a1   : > { %v475_v15 = vpop.permute.xlu1 %474  ;;  %v473_v16 = vpop.permute.xlu0 %472 }
 0x7a2   : > { %v476_v17 = vsel %vm457_vm0, %v473_v16, %v475_v15 }
 0x7a3   : > { %479 = vrot.lane.b32.xlu1 %v476_v17, %s1001_s23  ;;  %477 = vrot.lane.b32.xlu0 %v476_v17, %s1002_s24 }
 0x7a5   : > { %v501_v18 = vpop.permute.xlu1 %500  ;;  %v499_v19 = vpop.permute.xlu0 %498 }
 0x7a6   : > { %v502_v20 = vsel %vm457_vm0, %v499_v19, %v501_v18 }
 0x7a7   : > { %505 = vrot.lane.b32.xlu1 %v502_v20, %s1001_s23  ;;  %503 = vrot.lane.b32.xlu0 %v502_v20, %s1002_s24 }
 0x815   : > { %v480_v22 = vpop.permute.xlu1 %479  ;;  %v478_v23 = vpop.permute.xlu0 %477 }
 0x816   : > { %v481_v24 = vsel %vm459_vm1, %v478_v23, %v480_v22 }
 0x817   : > { %484 = vrot.lane.b32.xlu1 %v481_v24, %s1003_s26  ;;  %482 = vrot.lane.b32.xlu0 %v481_v24, %s1004_s27 }
 0x819   : > { %v506_v25 = vpop.permute.xlu1 %505  ;;  %v504_v26 = vpop.permute.xlu0 %503 }
 0x81a   : > { %v507_v27 = vsel %vm459_vm1, %v504_v26, %v506_v25 }
 0x81b   : > { %510 = vrot.lane.b32.xlu1 %v507_v27, %s1003_s26  ;;  %508 = vrot.lane.b32.xlu0 %v507_v27, %s1004_s27 }
 0x889   : > { %v485_v31 = vpop.permute.xlu1 %484  ;;  %v483_v32 = vpop.permute.xlu0 %482 }
 0x88a   : > { %v486_v33 = vsel %vm461_vm2, %v483_v32, %v485_v31 }
 0x88b   : > { %v487_v34 = vrot.slane %v486_v33, 6  ;;  %v488_v35 = vrot.slane %v486_v33, 2 }
 0x88d   : > { %v489_v36 = vsel %vm465_vm3, %v487_v34, %v488_v35  ;;  %v511_v37 = vpop.permute.xlu1 %510  ;;  %v509_v38 = vpop.permute.xlu0 %508 }
 0x88e   : > { %v490_v39 = vrot.slane %v489_v36, 4  ;;  %v512_v40 = vsel %vm461_vm2, %v509_v38, %v511_v37 }
 0x88f   : > { %v513_v41 = vrot.slane %v512_v40, 6  ;;  %v514_v42 = vrot.slane %v512_v40, 2 }
 0x890   : > { %491 = vst [vmem:[%s1076_s3 + $0x8] sm:$0xff] %v490_v39 }
 0x891   : > { %v515_v43 = vsel %vm465_vm3, %v513_v41, %v514_v42 }
 0x892   : > { %v516_v44 = vrot.slane %v515_v43, 4 }
 0x894   : > { %517 = vst [vmem:[%s1076_s3] sm:$0xff] %v516_v44 }
 0x895 PF: > { %p819_p5 = scmp.ne.s32.totalorder %s1071_s25, 6 }
 0x896   : > { %v555_v45 = vld [vmem:[%s1081_s9 + $0x8] sm:$0xff] (!%p819_p5)  ;;  %v534_v46 = vld [vmem:[%s1081_s9] sm:$0xff] (!%p819_p5)  ;;  %s1005_s28 = smov (!%p819_p5), 16   ;;  %s1006_s29 = smov (!%p819_p5), 112   ;;  %v522_v47 = vlaneseq (!%p819_p5) }
 0x897   : > { %521 = sbr.rel (%p819_p5) target bundleno = 2563 (0xa03), region = 52  ;;  %556 = vrot.lane.b32.xlu1 (!%p819_p5), %v555_v45, %s1005_s28  ;;  %535 = vrot.lane.b32.xlu0 (!%p819_p5), %v534_v46, %s1005_s28  ;;  %s1007_s30 = smov (!%p819_p5), 96  }
 0x898   : > { %v523_v48 = vand.u32 (!%p819_p5), 127, %v522_v47  ;;  %s1008_s4 = smov (!%p819_p5), 32   ;;  %s1009_s5 = smov (!%p819_p5), 64   ;;  %v529_v63 = vshrl.u32 (!%p819_p5), %v522_v47, 7 }
 0x89a   : > { %v524_v49 = vand.u32 (!%p819_p5), 16, %v523_v48  ;;  %v526_v56 = vand.u32 (!%p819_p5), 32, %v523_v48  ;;  %v530_v0 = vand.u32 (!%p819_p5), 1, %v529_v63  ;;  %v532_v1 = vand.u32 (!%p819_p5), 2, %v529_v63 }
 0x89b   : > { %558 = vrot.lane.b32.xlu1 (!%p819_p5), %v555_v45, %s1006_s29  ;;  %537 = vrot.lane.b32.xlu0 (!%p819_p5), %v534_v46, %s1006_s29 }
 0x89c   : > { %vm525_vm4 = vcmp.ne.s32.totalorder (!%p819_p5), %v524_v49, 0  ;;  %vm527_vm5 = vcmp.ne.s32.totalorder (!%p819_p5), %v526_v56, 0  ;;  %vm531_vm6 = vcmp.ne.s32.totalorder (!%p819_p5), %v530_v0, 0  ;;  %vm533_vm7 = vcmp.ne.s32.totalorder (!%p819_p5), %v532_v1, 0 }
 0x909   : > { %v557_v50 = vpop.permute.xlu1 %556  ;;  %v536_v51 = vpop.permute.xlu0 %535 }
 0x90d   : > { %v538_v52 = vpop.permute.xlu0 %537  ;;  %v559_v54 = vpop.permute.xlu1 %558 }
 0x90e   : > { %v539_v53 = vsel %vm525_vm4, %v536_v51, %v538_v52  ;;  %v560_v55 = vsel %vm525_vm4, %v557_v50, %v559_v54 }
 0x90f   : > { %542 = vrot.lane.b32.xlu1 %v539_v53, %s1007_s30  ;;  %540 = vrot.lane.b32.xlu0 %v539_v53, %s1008_s4 }
 0x913   : > { %563 = vrot.lane.b32.xlu1 %v560_v55, %s1007_s30  ;;  %561 = vrot.lane.b32.xlu0 %v560_v55, %s1008_s4 }
 0x981   : > { %v543_v57 = vpop.permute.xlu1 %542  ;;  %v541_v58 = vpop.permute.xlu0 %540 }
 0x982   : > { %v544_v59 = vsel %vm527_vm5, %v541_v58, %v543_v57 }
 0x983   : > { %545 = vrot.lane.b32.xlu0 %v544_v59, %s1009_s5 }
 0x985   : > { %v564_v60 = vpop.permute.xlu1 %563  ;;  %v562_v61 = vpop.permute.xlu0 %561 }
 0x986   : > { %v565_v62 = vsel %vm527_vm5, %v562_v61, %v564_v60 }
 0x987   : > { %566 = vrot.lane.b32.xlu1 %v565_v62, %s1009_s5 }
 0x9f5   : > { %v546_v2 = vpop.permute.xlu0 %545 }
 0x9f6   : > { %v547_v3 = vrot.slane %v546_v2, 7  ;;  %v548_v4 = vrot.slane %v546_v2, 1 }
 0x9f8   : > { %v549_v5 = vsel %vm531_vm6, %v547_v3, %v548_v4 }
 0x9f9   : > { %v550_v6 = vrot.slane %v549_v5, 6  ;;  %v551_v7 = vrot.slane %v549_v5, 2  ;;  %v567_v8 = vpop.permute.xlu1 %566 }
 0x9fa   : > { %v568_v9 = vrot.slane %v567_v8, 7  ;;  %v569_v10 = vrot.slane %v567_v8, 1 }
 0x9fb   : > { %v552_v11 = vsel %vm533_vm7, %v550_v6, %v551_v7 }
 0x9fc   : > { %v553_v12 = vrot.slane %v552_v11, 4  ;;  %v570_v13 = vsel %vm531_vm6, %v568_v9, %v569_v10 }
 0x9fd   : > { %v571_v14 = vrot.slane %v570_v13, 6  ;;  %v572_v15 = vrot.slane %v570_v13, 2 }
 0x9fe   : > { %554 = vst [vmem:[%s1076_s3 + $0x8] sm:$0xff] %v553_v12 }
 0x9ff   : > { %v573_v16 = vsel %vm533_vm7, %v571_v14, %v572_v15 }
 0xa00   : > { %v574_v17 = vrot.slane %v573_v16, 4 }
 0xa02   : > { %575 = vst [vmem:[%s1076_s3] sm:$0xff] %v574_v17 }
 0xa03 PF: > { %p820_p6 = scmp.ne.s32.totalorder %s1071_s25, 7 }
 0xa04   : > { %v641_v18 = vld [vmem:[%s1081_s9 + $0x8] sm:$0xff] (!%p820_p6)  ;;  %v600_v19 = vld [vmem:[%s1081_s9] sm:$0xff] (!%p820_p6)  ;;  %s1010_s6 = smov (!%p820_p6), 1   ;;  %s1011_s7 = smov (!%p820_p6), 127   ;;  %v580_v20 = vlaneseq (!%p820_p6) }
 0xa05   : > { %579 = sbr.rel (%p820_p6) target bundleno = 3393 (0xd41), region = 56  ;;  %642 = vrot.lane.b32.xlu1 (!%p820_p6), %v641_v18, %s1010_s6  ;;  %601 = vrot.lane.b32.xlu0 (!%p820_p6), %v600_v19, %s1010_s6  ;;  %s1012_s25 = smov (!%p820_p6), 126  }
 0xa06   : > { %v1132_v21 = vand.u32 (!%p820_p6), 127, %v580_v20  ;;  %s1013_s9 = smov (!%p820_p6), 2   ;;  %s1014_s8 = smov (!%p820_p6), 124   ;;  %v595_v0 = vshrl.u32 (!%p820_p6), %v580_v20, 7 }
 0xa07   : > { %s1015_s10 = smov (!%p820_p6), 4   ;;  %s1016_s11 = smov (!%p820_p6), 120  }
 0xa08   : > { %v582_v22 = vand.u32 (!%p820_p6), 1, %v1132_v21  ;;  %v584_v29 = vand.u32 (!%p820_p6), 2, %v1132_v21  ;;  %v586_v36 = vand.u32 (!%p820_p6), 4, %v1132_v21  ;;  %s1017_s12 = smov (!%p820_p6), 8   ;;  %v588_v43 = vand.u32 (!%p820_p6), 8, %v1132_v21  ;;  %s1018_s13 = smov (!%p820_p6), 112  }
 0xa09   : > { %644 = vrot.lane.b32.xlu1 (!%p820_p6), %v641_v18, %s1011_s7  ;;  %603 = vrot.lane.b32.xlu0 (!%p820_p6), %v600_v19, %s1011_s7  ;;  %s1019_s14 = smov (!%p820_p6), 16   ;;  %v590_v50 = vand.u32 (!%p820_p6), 16, %v1132_v21  ;;  %s1020_s15 = smov (!%p820_p6), 96   ;;  %v592_v57 = vand.u32 (!%p820_p6), 32, %v1132_v21  ;;  %v596_v1 = vand.u32 (!%p820_p6), 1, %v595_v0  ;;  %v598_v2 = vand.u32 (!%p820_p6), 2, %v595_v0 }
 0xa0a   : > { %vm583_vm8 = vcmp.ne.s32.totalorder (!%p820_p6), %v582_v22, 0  ;;  %vm585_vm9 = vcmp.ne.s32.totalorder (!%p820_p6), %v584_v29, 0  ;;  %vm587_vm10 = vcmp.ne.s32.totalorder (!%p820_p6), %v586_v36, 0  ;;  %vm589_vm11 = vcmp.ne.s32.totalorder (!%p820_p6), %v588_v43, 0  ;;  %s1021_s20 = smov (!%p820_p6), 32   ;;  %s1022_s21 = smov (!%p820_p6), 64  }
 0xa0b   : > { %vm591_vm12 = vcmp.ne.s32.totalorder (!%p820_p6), %v590_v50, 0  ;;  %vm593_vm13 = vcmp.ne.s32.totalorder (!%p820_p6), %v592_v57, 0  ;;  %vm597_vm14 = vcmp.ne.s32.totalorder (!%p820_p6), %v596_v1, 0  ;;  %vm599_vm15 = vcmp.ne.s32.totalorder (!%p820_p6), %v598_v2, 0 }
 0xa77   : > { %v643_v23 = vpop.permute.xlu1 %642  ;;  %v602_v24 = vpop.permute.xlu0 %601 }
 0xa7b   : > { %v604_v25 = vpop.permute.xlu0 %603  ;;  %v645_v27 = vpop.permute.xlu1 %644 }
 0xa7c   : > { %v605_v26 = vsel %vm583_vm8, %v602_v24, %v604_v25  ;;  %v646_v28 = vsel %vm583_vm8, %v643_v23, %v645_v27 }
 0xa7d   : > { %608 = vrot.lane.b32.xlu1 %v605_v26, %s1012_s25  ;;  %606 = vrot.lane.b32.xlu0 %v605_v26, %s1013_s9 }
 0xa81   : > { %649 = vrot.lane.b32.xlu1 %v646_v28, %s1012_s25  ;;  %647 = vrot.lane.b32.xlu0 %v646_v28, %s1013_s9 }
 0xaef   : > { %v609_v30 = vpop.permute.xlu1 %608  ;;  %v607_v31 = vpop.permute.xlu0 %606 }
 0xaf0   : > { %v610_v32 = vsel %vm585_vm9, %v607_v31, %v609_v30 }
 0xaf1   : > { %613 = vrot.lane.b32.xlu1 %v610_v32, %s1014_s8  ;;  %611 = vrot.lane.b32.xlu0 %v610_v32, %s1015_s10 }
 0xaf3   : > { %v650_v33 = vpop.permute.xlu1 %649  ;;  %v648_v34 = vpop.permute.xlu0 %647 }
 0xaf4   : > { %v651_v35 = vsel %vm585_vm9, %v648_v34, %v650_v33 }
 0xaf5   : > { %654 = vrot.lane.b32.xlu1 %v651_v35, %s1014_s8  ;;  %652 = vrot.lane.b32.xlu0 %v651_v35, %s1015_s10 }
 0xb63   : > { %v614_v37 = vpop.permute.xlu1 %613  ;;  %v612_v38 = vpop.permute.xlu0 %611 }
 0xb64   : > { %v615_v39 = vsel %vm587_vm10, %v612_v38, %v614_v37 }
 0xb65   : > { %618 = vrot.lane.b32.xlu1 %v615_v39, %s1016_s11  ;;  %616 = vrot.lane.b32.xlu0 %v615_v39, %s1017_s12 }
 0xb67   : > { %v655_v40 = vpop.permute.xlu1 %654  ;;  %v653_v41 = vpop.permute.xlu0 %652 }
 0xb68   : > { %v656_v42 = vsel %vm587_vm10, %v653_v41, %v655_v40 }
 0xb69   : > { %659 = vrot.lane.b32.xlu1 %v656_v42, %s1016_s11  ;;  %657 = vrot.lane.b32.xlu0 %v656_v42, %s1017_s12 }
 0xbd7   : > { %v619_v44 = vpop.permute.xlu1 %618  ;;  %v617_v45 = vpop.permute.xlu0 %616 }
 0xbd8   : > { %v620_v46 = vsel %vm589_vm11, %v617_v45, %v619_v44 }
 0xbd9   : > { %623 = vrot.lane.b32.xlu1 %v620_v46, %s1018_s13  ;;  %621 = vrot.lane.b32.xlu0 %v620_v46, %s1019_s14 }
 0xbdb   : > { %v660_v47 = vpop.permute.xlu1 %659  ;;  %v658_v48 = vpop.permute.xlu0 %657 }
 0xbdc   : > { %v661_v49 = vsel %vm589_vm11, %v658_v48, %v660_v47 }
 0xbdd   : > { %664 = vrot.lane.b32.xlu1 %v661_v49, %s1018_s13  ;;  %662 = vrot.lane.b32.xlu0 %v661_v49, %s1019_s14 }
 0xc4b   : > { %v624_v51 = vpop.permute.xlu1 %623  ;;  %v622_v52 = vpop.permute.xlu0 %621 }
 0xc4c   : > { %v625_v53 = vsel %vm591_vm12, %v622_v52, %v624_v51 }
 0xc4d   : > { %628 = vrot.lane.b32.xlu1 %v625_v53, %s1020_s15  ;;  %626 = vrot.lane.b32.xlu0 %v625_v53, %s1021_s20 }
 0xc4f   : > { %v665_v54 = vpop.permute.xlu1 %664  ;;  %v663_v55 = vpop.permute.xlu0 %662 }
 0xc50   : > { %v666_v56 = vsel %vm591_vm12, %v663_v55, %v665_v54 }
 0xc51   : > { %669 = vrot.lane.b32.xlu1 %v666_v56, %s1020_s15  ;;  %667 = vrot.lane.b32.xlu0 %v666_v56, %s1021_s20 }
 0xcbf   : > { %v629_v58 = vpop.permute.xlu1 %628  ;;  %v627_v59 = vpop.permute.xlu0 %626 }
 0xcc0   : > { %v630_v60 = vsel %vm593_vm13, %v627_v59, %v629_v58 }
 0xcc1   : > { %631 = vrot.lane.b32.xlu0 %v630_v60, %s1022_s21 }
 0xcc3   : > { %v670_v61 = vpop.permute.xlu1 %669  ;;  %v668_v62 = vpop.permute.xlu0 %667 }
 0xcc4   : > { %v671_v63 = vsel %vm593_vm13, %v668_v62, %v670_v61 }
 0xcc5   : > { %672 = vrot.lane.b32.xlu1 %v671_v63, %s1022_s21 }
 0xd33   : > { %v632_v3 = vpop.permute.xlu0 %631 }
 0xd34   : > { %v633_v4 = vrot.slane %v632_v3, 7  ;;  %v634_v5 = vrot.slane %v632_v3, 1 }
 0xd36   : > { %v635_v6 = vsel %vm597_vm14, %v633_v4, %v634_v5 }
 0xd37   : > { %v636_v7 = vrot.slane %v635_v6, 6  ;;  %v637_v8 = vrot.slane %v635_v6, 2  ;;  %v673_v9 = vpop.permute.xlu1 %672 }
 0xd38   : > { %v674_v10 = vrot.slane %v673_v9, 7  ;;  %v675_v11 = vrot.slane %v673_v9, 1 }
 0xd39   : > { %v638_v12 = vsel %vm599_vm15, %v636_v7, %v637_v8 }
 0xd3a   : > { %v639_v13 = vrot.slane %v638_v12, 4  ;;  %v676_v14 = vsel %vm597_vm14, %v674_v10, %v675_v11 }
 0xd3b   : > { %v677_v15 = vrot.slane %v676_v14, 6  ;;  %v678_v16 = vrot.slane %v676_v14, 2 }
 0xd3c   : > { %640 = vst [vmem:[%s1076_s3 + $0x8] sm:$0xff] %v639_v13 }
 0xd3d   : > { %v679_v17 = vsel %vm599_vm15, %v677_v15, %v678_v16 }
 0xd3e   : > { %v680_v18 = vrot.slane %v679_v17, 4 }
 0xd40   : > { %681 = vst [vmem:[%s1076_s3] sm:$0xff] %v680_v18 }
 0xd41 PF: > { %s18_s17 = sadd.s32 1, %s968_s17   ;;  %s1161_s14 = smov %s960_s16 }
 0xd42   : > { %p15_p7 = scmp.ge.s32.totalorder %s18_s17, 10   ;;  %s1162_s15 = smov %s964_s0 }
 0xd43   : > { %s1163_s16 = smov %s1166_s18  ;;  %s1164_s0 = smov %s1170_s19 }
 0xd44   :  { %17 = sbr.rel (!%p15_p7) target bundleno = 18 (0x12), region = 86 }

</bundles_post_ra>
